<compile_context>
chip_gen: v7x
topology: tpu7x:2x2x1
jax: 0.10.0
libtpu: 0.0.40
codegen_flags: <defaults>
</compile_context>

<pallas_src>
import jax
import jax.numpy as jnp
from jax.experimental import pallas as pl
from jax.experimental.pallas import tpu as pltpu

# ---------------- static problem sizes ----------------
BATCH       = 2      # independent forward passes, fused into one kernel step
NUM_NODES   = 64     # N  (nodes per batch element)
NODE_DIM    = 32     # D  = cfg.gnn_node_emb_dim
NUM_GRAPHS  = 4      # G  (graphs per batch element)
GLOBAL_DIM  = 8      # cfg.lesion_wide_feat_dim
POOLING_MUL = 4      # 'all_stats'
BN_EPS      = 1e-5

N_TOTAL   = BATCH * NUM_NODES     # 128 : all nodes, lane-friendly
G_TOTAL   = BATCH * NUM_GRAPHS    # 8   : all graphs, exactly one sublane pass
OUT_WIDTH = 128                   # lane-dense merged-output slab width

# ---- packed parameter slabs ----
# bf16 weight slab [W_SLAB_ROWS, 256]: each matrix at rows [off, off+fan_in), lanes [0, fan_out)
# (all row offsets are multiples of 16 -> clean bf16 (16,128) tile alignment)
W_OFF = {"w1a": 0, "w1b": 128, "w1c": 384, "w2h": 512, "w2g": 576,
         "w2b": 592, "w2c": 624, "w2d": 656}
W_SLAB_ROWS  = 672
W_SLAB_LANES = 256
# f32 bias slab [8, 256]: one bias vector per row, lanes [0, fan_out)
B_ROW = {"b1a": 0, "b1b": 1, "b1c": 2, "b2a": 3, "b2b": 4, "b2c": 5, "b2d": 6}
B_SLAB_ROWS = 8


# ---------------- Pallas kernel ----------------
def pooled_mlp_kernel(x_ref, brow_ref, bcol_ref, gfeat_ref, inv_ref,
                      w_ref, b_ref, out_ref):
    x = x_ref[...]          # [N_TOTAL, D]  f32  (nodes on sublanes, features on lanes)
    brow = brow_ref[...]    # [1, N_TOTAL]  i32  lane-dense graph ids (already offset by b*G)
    bcol = bcol_ref[...]    # [N_TOTAL, 1]  i32  sublane-aligned graph ids (masked min/max)
    inv = inv_ref[...]      # [G_TOTAL, 1]  f32  exact 1/count per graph

    # ---- all_statistics_pooling ----
    # sums / sums-of-squares via one block-diagonal one-hot [G_TOTAL, N_TOTAL] MXU matmul each
    gids = jax.lax.broadcasted_iota(jnp.int32, (G_TOTAL, N_TOTAL), 0)
    onehot = (gids == brow).astype(jnp.float32)                          # [8, 128]
    sums = jnp.dot(onehot, x, preferred_element_type=jnp.float32)        # [8, 32]
    sq = jnp.dot(onehot, x * x, preferred_element_type=jnp.float32)      # [8, 32]
    mean = sums * inv
    var = sq * inv - mean * mean     # variance (the torch source calls this 'std', no sqrt)

    # masked min/max: one select + one sublane max-reduce per graph over [x | -x]
    xx = jnp.concatenate([x, -x], axis=1)                                # [128, 64]
    rows = []
    for g in range(G_TOTAL):
        m = bcol == g                                                    # [128, 1] bool
        rows.append(jnp.max(jnp.where(m, xx, -jnp.inf), axis=0, keepdims=True))
    mxmn = jnp.concatenate(rows, axis=0)                                 # [8, 64] = [max | -min]
    mx = mxmn[:, :NODE_DIM]
    mn = -mxmn[:, NODE_DIM:]

    # torch order: hstack((mean, min, max, std)) -> one lane-dense [8, 128] block
    pooled = jnp.concatenate([mean, mn, mx, var], axis=1)                # [8, 128]

    # ---- packed-slab accessors (static, tile-aligned slices) ----
    def W(name, rows_, cols):
        off = W_OFF[name]
        return w_ref[off:off + rows_, 0:cols]          # bf16 weight block

    def Bias(name, cols):
        r = B_ROW[name]
        return b_ref[r:r + 1, 0:cols]                  # f32 bias row, broadcast over graphs

    def matmul(h, w):                                  # bf16 matmul, f32 accumulation
        return jnp.dot(h.astype(jnp.bfloat16), w, preferred_element_type=jnp.float32)

    # ---- lin1 (Linear + folded BN + ReLU + Dropout(id)) x3 ---- single K=128 first matmul
    h = jnp.maximum(matmul(pooled, W("w1a", 128, 256)) + Bias("b1a", 256), 0.0)
    h = jnp.maximum(matmul(h, W("w1b", 256, 128)) + Bias("b1b", 128), 0.0)
    h = jnp.maximum(matmul(h, W("w1c", 128, 64)) + Bias("b1c", 64), 0.0)     # [8, 64]

    # ---- lin2 ---- first layer: hstack([h, lesion_wide_feat]) @ w2a as two additive blocks
    a0 = (matmul(h, W("w2h", 64, 32))
          + matmul(gfeat_ref[...], W("w2g", 8, 32))
          + Bias("b2a", 32))                                                  # [8, 32]

    h2 = jnp.maximum(a0, 0.0)
    h2 = jnp.maximum(matmul(h2, W("w2b", 32, 32)) + Bias("b2b", 32), 0.0)
    h2 = jnp.maximum(matmul(h2, W("w2c", 32, 16)) + Bias("b2c", 16), 0.0)
    view_pre = matmul(h2, W("w2d", 16, 1)) + Bias("b2d", 1)                   # [8, 1]

    # single unmasked lane-dense [8, 128] store: a0 -> cols 0:32, view_pre -> col 32
    pad = jnp.zeros((G_TOTAL, OUT_WIDTH - NODE_DIM - 1), jnp.float32)
    out_ref[...] = jnp.concatenate([a0, view_pre, pad], axis=1)


# ---------------- wrapper ----------------
def configurable_pooling_forward(node_embs, batch_indexes, lesion_wide_feat, wslab, bslab):
    B, N, D = node_embs.shape
    x2 = node_embs.reshape(B * N, D)                                   # [128, 32]

    # offset graph ids by b*G so all B*G graphs are distinct (block-diagonal one-hot)
    offs = (jnp.arange(B, dtype=jnp.int32) * NUM_GRAPHS)[:, None]
    ids = (batch_indexes.astype(jnp.int32) + offs)                     # [B, N]
    brow = ids.reshape(1, B * N)                                       # lane-dense
    bcol = ids.reshape(B * N, 1)                                       # sublane-aligned

    gfeat = lesion_wide_feat.reshape(B * NUM_GRAPHS, GLOBAL_DIM)       # [8, 8]

    # exact per-graph 1/count (counts are small exact integers -> exact torch-like division)
    counts = jnp.zeros((B * NUM_GRAPHS,), jnp.float32).at[ids.reshape(-1)].add(1.0)
    inv = (1.0 / counts).reshape(B * NUM_GRAPHS, 1)                    # [8, 1]

    f = lambda i: (0, 0)   # single grid step; every block is the full array
    slab = pl.pallas_call(
        pooled_mlp_kernel,
        out_shape=jax.ShapeDtypeStruct((B * NUM_GRAPHS, OUT_WIDTH), jnp.float32),
        grid=(1,),
        in_specs=[
            pl.BlockSpec((B * N, D), f),
            pl.BlockSpec((1, B * N), f),
            pl.BlockSpec((B * N, 1), f),
            pl.BlockSpec((B * NUM_GRAPHS, GLOBAL_DIM), f),
            pl.BlockSpec((B * NUM_GRAPHS, 1), f),
            pl.BlockSpec((W_SLAB_ROWS, W_SLAB_LANES), f),
            pl.BlockSpec((B_SLAB_ROWS, W_SLAB_LANES), f),
        ],
        out_specs=pl.BlockSpec((B * NUM_GRAPHS, OUT_WIDTH), f),
        compiler_params=pltpu.CompilerParams(dimension_semantics=("arbitrary",)),
    )(x2, brow, bcol, gfeat, inv, wslab, bslab)

    out = slab[:, :NODE_DIM].reshape(B, NUM_GRAPHS, NODE_DIM)
    view_pre = slab[:, NODE_DIM:NODE_DIM + 1].reshape(B, NUM_GRAPHS, 1)
    return out, view_pre


# ---------------- deterministic parameter construction ----------------
def _linear(key, fan_in, fan_out):
    kw, kb = jax.random.split(key)
    bound = 1.0 / jnp.sqrt(fan_in)
    w = jax.random.uniform(kw, (fan_in, fan_out), jnp.float32, -bound, bound)
    b = jax.random.uniform(kb, (1, fan_out), jnp.float32, -bound, bound)
    return w, b


def _bn(key, dim):
    k1, k2, k3, k4 = jax.random.split(key, 4)
    gamma = jax.random.uniform(k1, (dim,), jnp.float32, 0.5, 1.5)
    beta = jax.random.uniform(k2, (dim,), jnp.float32, -0.2, 0.2)
    rmean = jax.random.uniform(k3, (dim,), jnp.float32, -0.1, 0.1)
    rvar = jax.random.uniform(k4, (dim,), jnp.float32, 0.5, 1.5)
    return gamma, beta, rmean, rvar


def _fold_bn(w, b, gamma, beta, rmean, rvar, eps=BN_EPS):
    s = gamma / jnp.sqrt(rvar + eps)
    return w * s[None, :], (b - rmean[None, :]) * s[None, :] + beta[None, :]


def make_params(key):
    in_dim = NODE_DIM * POOLING_MUL                     # 128
    lin1_dims = [(in_dim, 256), (256, 128), (128, 64)]
    lin2_dims = [(64 + GLOBAL_DIM, 32), (32, 32), (32, 16), (16, 1)]
    f32 = []
    for fi, fo in lin1_dims:                            # each lin1 Linear followed by BN
        key, k1, k2 = jax.random.split(key, 3)
        w, b = _linear(k1, fi, fo)
        w, b = _fold_bn(w, b, *_bn(k2, fo))
        f32.append((w, b))
    for i, (fi, fo) in enumerate(lin2_dims):            # first three lin2 Linears have BN
        key, k1, k2 = jax.random.split(key, 3)
        w, b = _linear(k1, fi, fo)
        if i < 3:
            w, b = _fold_bn(w, b, *_bn(k2, fo))
        f32.append((w, b))

    (w1a, b1a), (w1b, b1b), (w1c, b1c), (w2a, b2a), (w2b, b2b), (w2c, b2c), (w2d, b2d) = f32
    bf = lambda w: w.astype(jnp.bfloat16)

    # ---- pack weights into one contiguous bf16 slab ----
    wslab = jnp.zeros((W_SLAB_ROWS, W_SLAB_LANES), jnp.bfloat16)

    def place(slab, name, w):
        off = W_OFF[name]
        return slab.at[off:off + w.shape[0], 0:w.shape[1]].set(bf(w))

    wslab = place(wslab, "w1a", w1a)          # [128, 256]
    wslab = place(wslab, "w1b", w1b)          # [256, 128]
    wslab = place(wslab, "w1c", w1c)          # [128, 64]
    wslab = place(wslab, "w2h", w2a[:64])     # [64, 32]   (h block of lin2[0])
    wslab = place(wslab, "w2g", w2a[64:])     # [8, 32]    (lesion-wide block of lin2[0])
    wslab = place(wslab, "w2b", w2b)          # [32, 32]
    wslab = place(wslab, "w2c", w2c)          # [32, 16]
    wslab = place(wslab, "w2d", w2d)          # [16, 1]

    # ---- pack biases into one contiguous f32 slab ----
    bslab = jnp.zeros((B_SLAB_ROWS, W_SLAB_LANES), jnp.float32)
    for name, vec in (("b1a", b1a), ("b1b", b1b), ("b1c", b1c), ("b2a", b2a),
                      ("b2b", b2b), ("b2c", b2c), ("b2d", b2d)):
        r = B_ROW[name]
        bslab = bslab.at[r, 0:vec.shape[1]].set(vec[0])

    ref_params = [bf(w1a), b1a, bf(w1b), b1b, bf(w1c), b1c,
                  bf(w2a), b2a, bf(w2b), b2b, bf(w2c), b2c, bf(w2d), b2d]
    return wslab, bslab, ref_params


# ---------------- pure-JAX reference (torch-shaped math, same bf16 weights) ----------------
def reference_forward_single(x, bidx, gfeat, ref_params):
    rows = []
    for g in range(NUM_GRAPHS):
        mask = (bidx == g)[:, None]
        maskf = mask.astype(jnp.float32)
        cnt = jnp.sum(maskf)
        mean = jnp.sum(x * maskf, axis=0, keepdims=True) / cnt
        sq = jnp.sum(x * x * maskf, axis=0, keepdims=True) / cnt
        var = sq - mean * mean
        mx = jnp.max(jnp.where(mask, x, -jnp.inf), axis=0, keepdims=True)
        mn = jnp.min(jnp.where(mask, x, jnp.inf), axis=0, keepdims=True)
        rows.append(jnp.concatenate([mean, mn, mx, var], axis=1))
    pooled = jnp.concatenate(rows, axis=0)                                # [G, 4D]

    def lin(h, w, b):
        return jnp.dot(h.astype(jnp.bfloat16), w,
                       preferred_element_type=jnp.float32) + b

    (w1a, b1a, w1b, b1b, w1c, b1c,
     w2a, b2a, w2b, b2b, w2c, b2c, w2d, b2d) = ref_params
    h = jnp.maximum(lin(pooled, w1a, b1a), 0.0)
    h = jnp.maximum(lin(h, w1b, b1b), 0.0)
    h = jnp.maximum(lin(h, w1c, b1c), 0.0)
    z = jnp.concatenate([h, gfeat], axis=1)
    a0 = lin(z, w2a, b2a)
    h2 = jnp.maximum(a0, 0.0)
    h2 = jnp.maximum(lin(h2, w2b, b2b), 0.0)
    h2 = jnp.maximum(lin(h2, w2c, b2c), 0.0)
    view_pre = lin(h2, w2d, b2d)
    return a0, view_pre


if __name__ == "__main__":
    key = jax.random.PRNGKey(0)
    k_x, k_g, k_p, k_perm = jax.random.split(key, 4)

    node_embs = jax.random.normal(k_x, (BATCH, NUM_NODES, NODE_DIM), jnp.float32)
    base = jnp.repeat(jnp.arange(NUM_GRAPHS, dtype=jnp.int32), NUM_NODES // NUM_GRAPHS)
    # batch 0: contiguous graph assignment; batch 1: permuted (still every graph non-empty)
    batch_indexes = jnp.stack([base, jax.random.permutation(k_perm, base)], axis=0)
    lesion_wide_feat = jax.random.normal(k_g, (BATCH, NUM_GRAPHS, GLOBAL_DIM), jnp.float32)
    wslab, bslab, ref_params = make_params(k_p)

    out, view_pre = jax.jit(configurable_pooling_forward)(
        node_embs, batch_indexes, lesion_wide_feat, wslab, bslab)
    jax.block_until_ready((out, view_pre))

    ref_out, ref_view = [], []
    for b in range(BATCH):
        o, v = reference_forward_single(node_embs[b], batch_indexes[b],
                                        lesion_wide_feat[b], ref_params)
        ref_out.append(o)
        ref_view.append(v)
    ref_out = jnp.stack(ref_out)
    ref_view = jnp.stack(ref_view)

    assert out.shape == (BATCH, NUM_GRAPHS, 32)
    assert view_pre.shape == (BATCH, NUM_GRAPHS, 1)
    assert jnp.allclose(out, ref_out, rtol=1e-2, atol=1e-2), \
        float(jnp.max(jnp.abs(out - ref_out)))
    assert jnp.allclose(view_pre, ref_view, rtol=1e-2, atol=1e-2), \
        float(jnp.max(jnp.abs(view_pre - ref_view)))

    # TODO(synk): lesion_mask boolean-index gather (pool_only_lesion_points=True) is
    # data-dependent compaction; not implemented (config disables it).
    print("KERNEL_OK")
</pallas_src>

<mosaic_0001>
module attributes {stable_mosaic.version = 11 : i64} {
  func.func private @main(%arg0: i32) attributes {dimension_semantics = [#tpu.dimension_semantics<core_parallel>], iteration_bounds = array<i64: 2>, tpu.core_type = #tpu.core_type<sc_scalar_subcore>, window_params = []} {
    return
  }
}

module attributes {stable_mosaic.version = 11 : i64} {
  func.func private @main(%arg0: i32) attributes {dimension_semantics = [#tpu.dimension_semantics<core_parallel>], iteration_bounds = array<i64: 2>, tpu.core_type = #tpu.core_type<sc_scalar_subcore>, window_params = []} {
    return
  }
}

module attributes {stable_mosaic.version = 11 : i64} {
  func.func @pooled_mlp_kernel(%arg0: i32, %arg1: memref<128x32xf32, #tpu.memory_space<vmem>>, %arg2: memref<1x128xi32, #tpu.memory_space<vmem>>, %arg3: memref<128x1xi32, #tpu.memory_space<vmem>>, %arg4: memref<8x8xf32, #tpu.memory_space<vmem>>, %arg5: memref<8x1xf32, #tpu.memory_space<vmem>>, %arg6: memref<672x256xbf16, #tpu.memory_space<vmem>>, %arg7: memref<8x256xf32, #tpu.memory_space<vmem>>, %arg8: memref<8x128xf32, #tpu.memory_space<vmem>>) attributes {dimension_semantics = [#tpu.dimension_semantics<arbitrary>], iteration_bounds = array<i64: 1>, scalar_prefetch = 0 : i64, scratch_operands = 0 : i64, tpu.core_type = #tpu.core_type<tc>, window_params = [{pipeline_mode = #tpu.pipeline_mode<synchronous>, transform_indices = @transform_0, window_bounds = array<i64: 128, 32>}, {pipeline_mode = #tpu.pipeline_mode<synchronous>, transform_indices = @transform_1, window_bounds = array<i64: 1, 128>}, {pipeline_mode = #tpu.pipeline_mode<synchronous>, transform_indices = @transform_2, window_bounds = array<i64: 128, 1>}, {pipeline_mode = #tpu.pipeline_mode<synchronous>, transform_indices = @transform_3, window_bounds = array<i64: 8, 8>}, {pipeline_mode = #tpu.pipeline_mode<synchronous>, transform_indices = @transform_4, window_bounds = array<i64: 8, 1>}, {pipeline_mode = #tpu.pipeline_mode<synchronous>, transform_indices = @transform_5, window_bounds = array<i64: 672, 256>}, {pipeline_mode = #tpu.pipeline_mode<synchronous>, transform_indices = @transform_6, window_bounds = array<i64: 8, 256>}, {pipeline_mode = #tpu.pipeline_mode<synchronous>, transform_indices = @transform_7, window_bounds = array<i64: 8, 128>}]} {
    %c0 = arith.constant 0 : index
    %c0_0 = arith.constant 0 : index
    %0 = vector.load %arg1[%c0, %c0_0] : memref<128x32xf32, #tpu.memory_space<vmem>>, vector<128x32xf32>
    %c0_1 = arith.constant 0 : index
    %c0_2 = arith.constant 0 : index
    %1 = vector.load %arg2[%c0_1, %c0_2] : memref<1x128xi32, #tpu.memory_space<vmem>>, vector<1x128xi32>
    %c0_3 = arith.constant 0 : index
    %c0_4 = arith.constant 0 : index
    %2 = vector.load %arg3[%c0_3, %c0_4] : memref<128x1xi32, #tpu.memory_space<vmem>>, vector<128x1xi32>
    %c0_5 = arith.constant 0 : index
    %c0_6 = arith.constant 0 : index
    %3 = vector.load %arg5[%c0_5, %c0_6] : memref<8x1xf32, #tpu.memory_space<vmem>>, vector<8x1xf32>
    %4 = tpu.iota {dimensions = array<i32: 0>} : vector<8x128xi32>
    %5 = vector.broadcast %1 : vector<1x128xi32> to vector<8x128xi32>
    %6 = arith.cmpi eq, %4, %5 : vector<8x128xi32>
    %7 = arith.extui %6 : vector<8x128xi1> to vector<8x128xi32>
    %8 = arith.sitofp %7 : vector<8x128xi32> to vector<8x128xf32>
    %cst = arith.constant dense<0.000000e+00> : vector<8x32xf32>
    %9 = tpu.matmul %8, %0, %cst {dimension_numbers = #tpu.dot_dimension_numbers<[1], [0], [0], [1], [0, 0, 1, 1], [], []>} : vector<8x128xf32>, vector<128x32xf32>, vector<8x32xf32> -> vector<8x32xf32>
    %10 = arith.mulf %0, %0 : vector<128x32xf32>
    %cst_7 = arith.constant dense<0.000000e+00> : vector<8x32xf32>
    %11 = tpu.matmul %8, %10, %cst_7 {dimension_numbers = #tpu.dot_dimension_numbers<[1], [0], [0], [1], [0, 0, 1, 1], [], []>} : vector<8x128xf32>, vector<128x32xf32>, vector<8x32xf32> -> vector<8x32xf32>
    %12 = vector.broadcast %3 : vector<8x1xf32> to vector<8x32xf32>
    %13 = arith.mulf %9, %12 : vector<8x32xf32>
    %14 = vector.broadcast %3 : vector<8x1xf32> to vector<8x32xf32>
    %15 = arith.mulf %11, %14 : vector<8x32xf32>
    %16 = arith.mulf %13, %13 : vector<8x32xf32>
    %17 = arith.subf %15, %16 : vector<8x32xf32>
    %cst_8 = arith.constant 0.000000e+00 : f32
    %18 = vector.broadcast %cst_8 : f32 to vector<128x32xf32>
    %19 = arith.subf %18, %0 : vector<128x32xf32>
    %20 = tpu.concatenate %0, %19 in 1 : vector<128x32xf32>, vector<128x32xf32> -> vector<128x64xf32>
    %c0_i32 = arith.constant 0 : i32
    %21 = vector.broadcast %c0_i32 : i32 to vector<128x1xi32>
    %22 = arith.cmpi eq, %2, %21 : vector<128x1xi32>
    %cst_9 = arith.constant 0xFF800000 : f32
    %23 = vector.shape_cast %22 : vector<128x1xi1> to vector<128x1xi1>
    %24 = vector.broadcast %23 : vector<128x1xi1> to vector<128x64xi1>
    %25 = vector.broadcast %cst_9 : f32 to vector<128x64xf32>
    %26 = arith.select %24, %20, %25 : vector<128x64xi1>, vector<128x64xf32>
    %cst_10 = arith.constant dense<0xFF800000> : vector<64xf32>
    %27 = vector.multi_reduction <maximumf>, %26, %cst_10 [0] : vector<128x64xf32> to vector<64xf32>
    %28 = vector.shape_cast %27 : vector<64xf32> to vector<1x64xf32>
    %c1_i32 = arith.constant 1 : i32
    %29 = vector.broadcast %c1_i32 : i32 to vector<128x1xi32>
    %30 = arith.cmpi eq, %2, %29 : vector<128x1xi32>
    %cst_11 = arith.constant 0xFF800000 : f32
    %31 = vector.shape_cast %30 : vector<128x1xi1> to vector<128x1xi1>
    %32 = vector.broadcast %31 : vector<128x1xi1> to vector<128x64xi1>
    %33 = vector.broadcast %cst_11 : f32 to vector<128x64xf32>
    %34 = arith.select %32, %20, %33 : vector<128x64xi1>, vector<128x64xf32>
    %cst_12 = arith.constant dense<0xFF800000> : vector<64xf32>
    %35 = vector.multi_reduction <maximumf>, %34, %cst_12 [0] : vector<128x64xf32> to vector<64xf32>
    %36 = vector.shape_cast %35 : vector<64xf32> to vector<1x64xf32>
    %c2_i32 = arith.constant 2 : i32
    %37 = vector.broadcast %c2_i32 : i32 to vector<128x1xi32>
    %38 = arith.cmpi eq, %2, %37 : vector<128x1xi32>
    %cst_13 = arith.constant 0xFF800000 : f32
    %39 = vector.shape_cast %38 : vector<128x1xi1> to vector<128x1xi1>
    %40 = vector.broadcast %39 : vector<128x1xi1> to vector<128x64xi1>
    %41 = vector.broadcast %cst_13 : f32 to vector<128x64xf32>
    %42 = arith.select %40, %20, %41 : vector<128x64xi1>, vector<128x64xf32>
    %cst_14 = arith.constant dense<0xFF800000> : vector<64xf32>
    %43 = vector.multi_reduction <maximumf>, %42, %cst_14 [0] : vector<128x64xf32> to vector<64xf32>
    %44 = vector.shape_cast %43 : vector<64xf32> to vector<1x64xf32>
    %c3_i32 = arith.constant 3 : i32
    %45 = vector.broadcast %c3_i32 : i32 to vector<128x1xi32>
    %46 = arith.cmpi eq, %2, %45 : vector<128x1xi32>
    %cst_15 = arith.constant 0xFF800000 : f32
    %47 = vector.shape_cast %46 : vector<128x1xi1> to vector<128x1xi1>
    %48 = vector.broadcast %47 : vector<128x1xi1> to vector<128x64xi1>
    %49 = vector.broadcast %cst_15 : f32 to vector<128x64xf32>
    %50 = arith.select %48, %20, %49 : vector<128x64xi1>, vector<128x64xf32>
    %cst_16 = arith.constant dense<0xFF800000> : vector<64xf32>
    %51 = vector.multi_reduction <maximumf>, %50, %cst_16 [0] : vector<128x64xf32> to vector<64xf32>
    %52 = vector.shape_cast %51 : vector<64xf32> to vector<1x64xf32>
    %c4_i32 = arith.constant 4 : i32
    %53 = vector.broadcast %c4_i32 : i32 to vector<128x1xi32>
    %54 = arith.cmpi eq, %2, %53 : vector<128x1xi32>
    %cst_17 = arith.constant 0xFF800000 : f32
    %55 = vector.shape_cast %54 : vector<128x1xi1> to vector<128x1xi1>
    %56 = vector.broadcast %55 : vector<128x1xi1> to vector<128x64xi1>
    %57 = vector.broadcast %cst_17 : f32 to vector<128x64xf32>
    %58 = arith.select %56, %20, %57 : vector<128x64xi1>, vector<128x64xf32>
    %cst_18 = arith.constant dense<0xFF800000> : vector<64xf32>
    %59 = vector.multi_reduction <maximumf>, %58, %cst_18 [0] : vector<128x64xf32> to vector<64xf32>
    %60 = vector.shape_cast %59 : vector<64xf32> to vector<1x64xf32>
    %c5_i32 = arith.constant 5 : i32
    %61 = vector.broadcast %c5_i32 : i32 to vector<128x1xi32>
    %62 = arith.cmpi eq, %2, %61 : vector<128x1xi32>
    %cst_19 = arith.constant 0xFF800000 : f32
    %63 = vector.shape_cast %62 : vector<128x1xi1> to vector<128x1xi1>
    %64 = vector.broadcast %63 : vector<128x1xi1> to vector<128x64xi1>
    %65 = vector.broadcast %cst_19 : f32 to vector<128x64xf32>
    %66 = arith.select %64, %20, %65 : vector<128x64xi1>, vector<128x64xf32>
    %cst_20 = arith.constant dense<0xFF800000> : vector<64xf32>
    %67 = vector.multi_reduction <maximumf>, %66, %cst_20 [0] : vector<128x64xf32> to vector<64xf32>
    %68 = vector.shape_cast %67 : vector<64xf32> to vector<1x64xf32>
    %c6_i32 = arith.constant 6 : i32
    %69 = vector.broadcast %c6_i32 : i32 to vector<128x1xi32>
    %70 = arith.cmpi eq, %2, %69 : vector<128x1xi32>
    %cst_21 = arith.constant 0xFF800000 : f32
    %71 = vector.shape_cast %70 : vector<128x1xi1> to vector<128x1xi1>
    %72 = vector.broadcast %71 : vector<128x1xi1> to vector<128x64xi1>
    %73 = vector.broadcast %cst_21 : f32 to vector<128x64xf32>
    %74 = arith.select %72, %20, %73 : vector<128x64xi1>, vector<128x64xf32>
    %cst_22 = arith.constant dense<0xFF800000> : vector<64xf32>
    %75 = vector.multi_reduction <maximumf>, %74, %cst_22 [0] : vector<128x64xf32> to vector<64xf32>
    %76 = vector.shape_cast %75 : vector<64xf32> to vector<1x64xf32>
    %c7_i32 = arith.constant 7 : i32
    %77 = vector.broadcast %c7_i32 : i32 to vector<128x1xi32>
    %78 = arith.cmpi eq, %2, %77 : vector<128x1xi32>
    %cst_23 = arith.constant 0xFF800000 : f32
    %79 = vector.shape_cast %78 : vector<128x1xi1> to vector<128x1xi1>
    %80 = vector.broadcast %79 : vector<128x1xi1> to vector<128x64xi1>
    %81 = vector.broadcast %cst_23 : f32 to vector<128x64xf32>
    %82 = arith.select %80, %20, %81 : vector<128x64xi1>, vector<128x64xf32>
    %cst_24 = arith.constant dense<0xFF800000> : vector<64xf32>
    %83 = vector.multi_reduction <maximumf>, %82, %cst_24 [0] : vector<128x64xf32> to vector<64xf32>
    %84 = vector.shape_cast %83 : vector<64xf32> to vector<1x64xf32>
    %85 = tpu.concatenate %28, %36, %44, %52, %60, %68, %76, %84 in 0 : vector<1x64xf32>, vector<1x64xf32>, vector<1x64xf32>, vector<1x64xf32>, vector<1x64xf32>, vector<1x64xf32>, vector<1x64xf32>, vector<1x64xf32> -> vector<8x64xf32>
    %86 = vector.extract_strided_slice %85 {offsets = [0, 0], sizes = [8, 32], strides = [1, 1]} : vector<8x64xf32> to vector<8x32xf32>
    %87 = vector.extract_strided_slice %85 {offsets = [0, 32], sizes = [8, 32], strides = [1, 1]} : vector<8x64xf32> to vector<8x32xf32>
    %cst_25 = arith.constant 0.000000e+00 : f32
    %88 = vector.broadcast %cst_25 : f32 to vector<8x32xf32>
    %89 = arith.subf %88, %87 : vector<8x32xf32>
    %90 = tpu.concatenate %13, %89, %86, %17 in 1 : vector<8x32xf32>, vector<8x32xf32>, vector<8x32xf32>, vector<8x32xf32> -> vector<8x128xf32>
    %c0_26 = arith.constant 0 : index
    %c0_27 = arith.constant 0 : index
    %91 = vector.load %arg6[%c0_26, %c0_27] : memref<672x256xbf16, #tpu.memory_space<vmem>>, vector<128x256xbf16>
    %92 = arith.truncf %90 : vector<8x128xf32> to vector<8x128xbf16>
    %cst_28 = arith.constant dense<0.000000e+00> : vector<8x256xf32>
    %93 = tpu.matmul %92, %91, %cst_28 {dimension_numbers = #tpu.dot_dimension_numbers<[1], [0], [0], [1], [0, 0, 1, 1], [], []>} : vector<8x128xbf16>, vector<128x256xbf16>, vector<8x256xf32> -> vector<8x256xf32>
    %c0_29 = arith.constant 0 : index
    %c0_30 = arith.constant 0 : index
    %94 = vector.load %arg7[%c0_29, %c0_30] : memref<8x256xf32, #tpu.memory_space<vmem>>, vector<1x256xf32>
    %95 = vector.broadcast %94 : vector<1x256xf32> to vector<8x256xf32>
    %96 = arith.addf %93, %95 : vector<8x256xf32>
    %cst_31 = arith.constant 0.000000e+00 : f32
    %97 = vector.broadcast %cst_31 : f32 to vector<8x256xf32>
    %98 = arith.maximumf %96, %97 : vector<8x256xf32>
    %c128 = arith.constant 128 : index
    %c0_32 = arith.constant 0 : index
    %99 = vector.load %arg6[%c128, %c0_32] : memref<672x256xbf16, #tpu.memory_space<vmem>>, vector<256x128xbf16>
    %100 = arith.truncf %98 : vector<8x256xf32> to vector<8x256xbf16>
    %cst_33 = arith.constant dense<0.000000e+00> : vector<8x128xf32>
    %101 = tpu.matmul %100, %99, %cst_33 {dimension_numbers = #tpu.dot_dimension_numbers<[1], [0], [0], [1], [0, 0, 1, 1], [], []>} : vector<8x256xbf16>, vector<256x128xbf16>, vector<8x128xf32> -> vector<8x128xf32>
    %c1 = arith.constant 1 : index
    %c0_34 = arith.constant 0 : index
    %102 = vector.load %arg7[%c1, %c0_34] : memref<8x256xf32, #tpu.memory_space<vmem>>, vector<1x128xf32>
    %103 = vector.broadcast %102 : vector<1x128xf32> to vector<8x128xf32>
    %104 = arith.addf %101, %103 : vector<8x128xf32>
    %cst_35 = arith.constant 0.000000e+00 : f32
    %105 = vector.broadcast %cst_35 : f32 to vector<8x128xf32>
    %106 = arith.maximumf %104, %105 : vector<8x128xf32>
    %c384 = arith.constant 384 : index
    %c0_36 = arith.constant 0 : index
    %107 = vector.load %arg6[%c384, %c0_36] : memref<672x256xbf16, #tpu.memory_space<vmem>>, vector<128x64xbf16>
    %108 = arith.truncf %106 : vector<8x128xf32> to vector<8x128xbf16>
    %cst_37 = arith.constant dense<0.000000e+00> : vector<8x64xf32>
    %109 = tpu.matmul %108, %107, %cst_37 {dimension_numbers = #tpu.dot_dimension_numbers<[1], [0], [0], [1], [0, 0, 1, 1], [], []>} : vector<8x128xbf16>, vector<128x64xbf16>, vector<8x64xf32> -> vector<8x64xf32>
    %c2 = arith.constant 2 : index
    %c0_38 = arith.constant 0 : index
    %110 = vector.load %arg7[%c2, %c0_38] : memref<8x256xf32, #tpu.memory_space<vmem>>, vector<1x64xf32>
    %111 = vector.broadcast %110 : vector<1x64xf32> to vector<8x64xf32>
    %112 = arith.addf %109, %111 : vector<8x64xf32>
    %cst_39 = arith.constant 0.000000e+00 : f32
    %113 = vector.broadcast %cst_39 : f32 to vector<8x64xf32>
    %114 = arith.maximumf %112, %113 : vector<8x64xf32>
    %c512 = arith.constant 512 : index
    %c0_40 = arith.constant 0 : index
    %115 = vector.load %arg6[%c512, %c0_40] : memref<672x256xbf16, #tpu.memory_space<vmem>>, vector<64x32xbf16>
    %116 = arith.truncf %114 : vector<8x64xf32> to vector<8x64xbf16>
    %cst_41 = arith.constant dense<0.000000e+00> : vector<8x32xf32>
    %117 = tpu.matmul %116, %115, %cst_41 {dimension_numbers = #tpu.dot_dimension_numbers<[1], [0], [0], [1], [0, 0, 1, 1], [], []>} : vector<8x64xbf16>, vector<64x32xbf16>, vector<8x32xf32> -> vector<8x32xf32>
    %c0_42 = arith.constant 0 : index
    %c0_43 = arith.constant 0 : index
    %118 = vector.load %arg4[%c0_42, %c0_43] : memref<8x8xf32, #tpu.memory_space<vmem>>, vector<8x8xf32>
    %c576 = arith.constant 576 : index
    %c0_44 = arith.constant 0 : index
    %119 = vector.load %arg6[%c576, %c0_44] : memref<672x256xbf16, #tpu.memory_space<vmem>>, vector<8x32xbf16>
    %120 = arith.truncf %118 : vector<8x8xf32> to vector<8x8xbf16>
    %cst_45 = arith.constant dense<0.000000e+00> : vector<8x32xf32>
    %121 = tpu.matmul %120, %119, %cst_45 {dimension_numbers = #tpu.dot_dimension_numbers<[1], [0], [0], [1], [0, 0, 1, 1], [], []>} : vector<8x8xbf16>, vector<8x32xbf16>, vector<8x32xf32> -> vector<8x32xf32>
    %122 = arith.addf %117, %121 : vector<8x32xf32>
    %c3 = arith.constant 3 : index
    %c0_46 = arith.constant 0 : index
    %123 = vector.load %arg7[%c3, %c0_46] : memref<8x256xf32, #tpu.memory_space<vmem>>, vector<1x32xf32>
    %124 = vector.broadcast %123 : vector<1x32xf32> to vector<8x32xf32>
    %125 = arith.addf %122, %124 : vector<8x32xf32>
    %cst_47 = arith.constant 0.000000e+00 : f32
    %126 = vector.broadcast %cst_47 : f32 to vector<8x32xf32>
    %127 = arith.maximumf %125, %126 : vector<8x32xf32>
    %c592 = arith.constant 592 : index
    %c0_48 = arith.constant 0 : index
    %128 = vector.load %arg6[%c592, %c0_48] : memref<672x256xbf16, #tpu.memory_space<vmem>>, vector<32x32xbf16>
    %129 = arith.truncf %127 : vector<8x32xf32> to vector<8x32xbf16>
    %cst_49 = arith.constant dense<0.000000e+00> : vector<8x32xf32>
    %130 = tpu.matmul %129, %128, %cst_49 {dimension_numbers = #tpu.dot_dimension_numbers<[1], [0], [0], [1], [0, 0, 1, 1], [], []>} : vector<8x32xbf16>, vector<32x32xbf16>, vector<8x32xf32> -> vector<8x32xf32>
    %c4 = arith.constant 4 : index
    %c0_50 = arith.constant 0 : index
    %131 = vector.load %arg7[%c4, %c0_50] : memref<8x256xf32, #tpu.memory_space<vmem>>, vector<1x32xf32>
    %132 = vector.broadcast %131 : vector<1x32xf32> to vector<8x32xf32>
    %133 = arith.addf %130, %132 : vector<8x32xf32>
    %cst_51 = arith.constant 0.000000e+00 : f32
    %134 = vector.broadcast %cst_51 : f32 to vector<8x32xf32>
    %135 = arith.maximumf %133, %134 : vector<8x32xf32>
    %c624 = arith.constant 624 : index
    %c0_52 = arith.constant 0 : index
    %136 = vector.load %arg6[%c624, %c0_52] : memref<672x256xbf16, #tpu.memory_space<vmem>>, vector<32x16xbf16>
    %137 = arith.truncf %135 : vector<8x32xf32> to vector<8x32xbf16>
    %cst_53 = arith.constant dense<0.000000e+00> : vector<8x16xf32>
    %138 = tpu.matmul %137, %136, %cst_53 {dimension_numbers = #tpu.dot_dimension_numbers<[1], [0], [0], [1], [0, 0, 1, 1], [], []>} : vector<8x32xbf16>, vector<32x16xbf16>, vector<8x16xf32> -> vector<8x16xf32>
    %c5 = arith.constant 5 : index
    %c0_54 = arith.constant 0 : index
    %139 = vector.load %arg7[%c5, %c0_54] : memref<8x256xf32, #tpu.memory_space<vmem>>, vector<1x16xf32>
    %140 = vector.broadcast %139 : vector<1x16xf32> to vector<8x16xf32>
    %141 = arith.addf %138, %140 : vector<8x16xf32>
    %cst_55 = arith.constant 0.000000e+00 : f32
    %142 = vector.broadcast %cst_55 : f32 to vector<8x16xf32>
    %143 = arith.maximumf %141, %142 : vector<8x16xf32>
    %c656 = arith.constant 656 : index
    %c0_56 = arith.constant 0 : index
    %144 = vector.load %arg6[%c656, %c0_56] : memref<672x256xbf16, #tpu.memory_space<vmem>>, vector<16x1xbf16>
    %145 = arith.truncf %143 : vector<8x16xf32> to vector<8x16xbf16>
    %cst_57 = arith.constant dense<0.000000e+00> : vector<8x1xf32>
    %146 = tpu.matmul %145, %144, %cst_57 {dimension_numbers = #tpu.dot_dimension_numbers<[1], [0], [0], [1], [0, 0, 1, 1], [], []>} : vector<8x16xbf16>, vector<16x1xbf16>, vector<8x1xf32> -> vector<8x1xf32>
    %c6 = arith.constant 6 : index
    %c0_58 = arith.constant 0 : index
    %147 = vector.load %arg7[%c6, %c0_58] : memref<8x256xf32, #tpu.memory_space<vmem>>, vector<1x1xf32>
    %148 = vector.broadcast %147 : vector<1x1xf32> to vector<8x1xf32>
    %149 = arith.addf %146, %148 : vector<8x1xf32>
    %cst_59 = arith.constant 0.000000e+00 : f32
    %150 = vector.broadcast %cst_59 : f32 to vector<8x95xf32>
    %151 = tpu.concatenate %125, %149, %150 in 1 : vector<8x32xf32>, vector<8x1xf32>, vector<8x95xf32> -> vector<8x128xf32>
    %c0_60 = arith.constant 0 : index
    %c0_61 = arith.constant 0 : index
    %152 = vector.load %arg8[%c0_60, %c0_61] : memref<8x128xf32, #tpu.memory_space<vmem>>, vector<8x128xf32>
    tpu.vector_store %arg8[%c0_60, %c0_61], %151 {strides = array<i32>} : memref<8x128xf32, #tpu.memory_space<vmem>>, vector<8x128xf32>,
    return
  }
  func.func @transform_0(%arg0: i32) -> (i32, i32) {
    %c0_i32 = arith.constant 0 : i32
    %c0_i32_0 = arith.constant 0 : i32
    %c0_i32_1 = arith.constant 0 : i32
    return %c0_i32, %c0_i32_0 : i32, i32
  }
  func.func @transform_1(%arg0: i32) -> (i32, i32) {
    %c0_i32 = arith.constant 0 : i32
    %c0_i32_0 = arith.constant 0 : i32
    %c0_i32_1 = arith.constant 0 : i32
    return %c0_i32, %c0_i32_0 : i32, i32
  }
  func.func @transform_2(%arg0: i32) -> (i32, i32) {
    %c0_i32 = arith.constant 0 : i32
    %c0_i32_0 = arith.constant 0 : i32
    %c0_i32_1 = arith.constant 0 : i32
    return %c0_i32, %c0_i32_0 : i32, i32
  }
  func.func @transform_3(%arg0: i32) -> (i32, i32) {
    %c0_i32 = arith.constant 0 : i32
    %c0_i32_0 = arith.constant 0 : i32
    %c0_i32_1 = arith.constant 0 : i32
    return %c0_i32, %c0_i32_0 : i32, i32
  }
  func.func @transform_4(%arg0: i32) -> (i32, i32) {
    %c0_i32 = arith.constant 0 : i32
    %c0_i32_0 = arith.constant 0 : i32
    %c0_i32_1 = arith.constant 0 : i32
    return %c0_i32, %c0_i32_0 : i32, i32
  }
  func.func @transform_5(%arg0: i32) -> (i32, i32) {
    %c0_i32 = arith.constant 0 : i32
    %c0_i32_0 = arith.constant 0 : i32
    %c0_i32_1 = arith.constant 0 : i32
    return %c0_i32, %c0_i32_0 : i32, i32
  }
  func.func @transform_6(%arg0: i32) -> (i32, i32) {
    %c0_i32 = arith.constant 0 : i32
    %c0_i32_0 = arith.constant 0 : i32
    %c0_i32_1 = arith.constant 0 : i32
    return %c0_i32, %c0_i32_0 : i32, i32
  }
  func.func @transform_7(%arg0: i32) -> (i32, i32) {
    %c0_i32 = arith.constant 0 : i32
    %c0_i32_0 = arith.constant 0 : i32
    %c0_i32_1 = arith.constant 0 : i32
    return %c0_i32, %c0_i32_0 : i32, i32
  }
}

</mosaic_0001>

<bundles_post_ra>
// kernel: configurable_pooling_forward.1
= control target key start
LH: loop header
LB: loop body
LE: loop exit
PB: predicated region body
PF: predicated region fallthrough
CT: control target
= control target key end

     0   :  { %v4579_v0 = vmov 0   ;;  %v2702_v47 = vmov 0.0|0.0   ;;  %s2707_s30 = smov 96   ;;  %s2708_s23 = smov 64   ;;  %s4558_s2 = inlined_call_operand.vmem [shape: s32[128,1], index: 2, kind: input, shape index: {}]   ;;  %s4559_s0 = inlined_call_operand.vmem [shape: f32[128,32], index: 0, kind: input, shape index: {}]   ;;  %s4560_s1 = inlined_call_operand.vmem [shape: s32[1,128], index: 1, kind: input, shape index: {}]   ;;  %s4561_s4 = inlined_call_operand.vmem [shape: f32[8,1], index: 4, kind: input, shape index: {}]   ;;  %s4562_s5 = inlined_call_operand.vmem [shape: bf16[672,256], index: 5, kind: input, shape index: {}]   ;;  %s4563_s6 = inlined_call_operand.vmem [shape: f32[8,256], index: 6, kind: input, shape index: {}]   ;;  %s4564_s3 = inlined_call_operand.vmem [shape: f32[8,8], index: 3, kind: input, shape index: {}]   ;;  %s4565_s7 = inlined_call_operand.vmem [shape: f32[8,128], index: 7, kind: output, shape index: {}]  }
   0x1   :  { %2627 = vset.pattern.permute.xlu1 %v4579_v0  ;;  %2626 = vset.pattern.permute.xlu0 %v4579_v0  ;;  %v2754_v1 = vld [vmem:[%s4558_s2 + $0x10] sm:$0xff]  ;;  %v2759_v2 = vld [vmem:[%s4558_s2] sm:$0xff]  ;;  %v2764_v3 = vld [vmem:[%s4558_s2 + $0x18] sm:$0xff] }
   0x2   :  { %vm334_vm0 = vcmp.eq.s32.totalorder %v2754_v1, 0  ;;  %vm332_vm1 = vcmp.eq.s32.totalorder %v2759_v2, 0  ;;  %vm335_vm2 = vcmp.eq.s32.totalorder %v2764_v3, 0  ;;  %v2772_v4 = vld [vmem:[%s4558_s2 + $0x8] sm:$0xff]  ;;  %v2785_v8 = vld [vmem:[%s4558_s2 + $0x20] sm:$0xff]  ;;  %v2794_v11 = vld [vmem:[%s4558_s2 + $0x38] sm:$0xff]  ;;  %2570 = vmatprep.subr.bf16.mxu0 %v2702_v47  ;;  %2594 = vmatprep.subr.bf16.mxu1 %v2702_v47 }
   0x3   :  { %v350_v5 = vsel %vm334_vm0, 1, %v4579_v0  ;;  %v348_v6 = vsel %vm332_vm1, 1, %v4579_v0  ;;  %vm333_vm3 = vcmp.eq.s32.totalorder %v2772_v4, 0  ;;  %v2780_v7 = vld [vmem:[%s4558_s2 + $0x28] sm:$0xff]  ;;  %v351_v9 = vsel %vm335_vm2, 1, %v4579_v0  ;;  %v2799_v12 = vld [vmem:[%s4558_s2 + $0x30] sm:$0xff] }
   0x4   :  { %371 = vperm.xlu1 %2627, %v350_v5   ;;  %365 = vperm.xlu0 %2626, %v348_v6   ;;  %v349_v10 = vsel %vm333_vm3, 1, %v4579_v0  ;;  %vm337_vm4 = vcmp.eq.s32.totalorder %v2780_v7, 0  ;;  %vm336_vm5 = vcmp.eq.s32.totalorder %v2785_v8, 0  ;;  %vm339_vm6 = vcmp.eq.s32.totalorder %v2794_v11, 0  ;;  %v2840_v31 = vld [vmem:[%s4558_s2 + $0x48] sm:$0xff]  ;;  %v2845_v32 = vld [vmem:[%s4558_s2 + $0x40] sm:$0xff] }
   0x5   :  { %v353_v13 = vsel %vm337_vm4, 1, %v4579_v0  ;;  %v352_v14 = vsel %vm336_vm5, 1, %v4579_v0  ;;  %vm338_vm7 = vcmp.eq.s32.totalorder %v2799_v12, 0  ;;  %v355_v15 = vsel %vm339_vm6, 1, %v4579_v0  ;;  %v2850_v33 = vld [vmem:[%s4559_s0] sm:$0xff]  ;;  %v2855_v34 = vld [vmem:[%s4559_s0 + $0x8] sm:$0xff] }
   0x6   :  { %v354_v16 = vsel %vm338_vm7, 1, %v4579_v0  ;;  %vm483_vm8 = vcmp.eq.s32.totalorder %v2772_v4, 1  ;;  %vm482_vm9 = vcmp.eq.s32.totalorder %v2759_v2, 1  ;;  %vm485_vm10 = vcmp.eq.s32.totalorder %v2764_v3, 1  ;;  %v2868_v39 = vld [vmem:[%s4558_s2 + $0x58] sm:$0xff]  ;;  %v2873_v40 = vld [vmem:[%s4558_s2 + $0x50] sm:$0xff] }
   0x7   :  { %v499_v17 = vsel %vm483_vm8, 1, %v4579_v0  ;;  %v498_v18 = vsel %vm482_vm9, 1, %v4579_v0  ;;  %vm484_vm11 = vcmp.eq.s32.totalorder %v2754_v1, 1  ;;  %v501_v19 = vsel %vm485_vm10, 1, %v4579_v0  ;;  %v2880_v43 = vld [vmem:[%s4559_s0 + $0x10] sm:$0xff]  ;;  %v2885_v44 = vld [vmem:[%s4559_s0 + $0x18] sm:$0xff] }
   0x8   :  { %374 = vperm.xlu1 %2627, %v351_v9   ;;  %368 = vperm.xlu0 %2626, %v349_v10   ;;  %v500_v20 = vsel %vm484_vm11, 1, %v4579_v0  ;;  %vm487_vm12 = vcmp.eq.s32.totalorder %v2780_v7, 1  ;;  %vm486_vm13 = vcmp.eq.s32.totalorder %v2785_v8, 1  ;;  %vm489_vm14 = vcmp.eq.s32.totalorder %v2794_v11, 1  ;;  %v2904_v52 = vld [vmem:[%s4559_s0 + $0x20] sm:$0xff]  ;;  %v2909_v53 = vld [vmem:[%s4559_s0 + $0x28] sm:$0xff] }
   0x9   :  { %v503_v21 = vsel %vm487_vm12, 1, %v4579_v0  ;;  %v502_v22 = vsel %vm486_vm13, 1, %v4579_v0  ;;  %vm488_vm15 = vcmp.eq.s32.totalorder %v2799_v12, 1  ;;  %v505_v23 = vsel %vm489_vm14, 1, %v4579_v0  ;;  %v2926_v60 = vld [vmem:[%s4559_s0 + $0x30] sm:$0xff]  ;;  %v2931_v61 = vld [vmem:[%s4559_s0 + $0x38] sm:$0xff] }
   0xa   :  { %v504_v24 = vsel %vm488_vm15, 1, %v4579_v0  ;;  %vm632_vm0 = vcmp.eq.s32.totalorder %v2772_v4, 2  ;;  %vm631_vm1 = vcmp.eq.s32.totalorder %v2759_v2, 2  ;;  %vm634_vm2 = vcmp.eq.s32.totalorder %v2764_v3, 2 }
   0xb   :  { %v648_v25 = vsel %vm632_vm0, 1, %v4579_v0  ;;  %v647_v26 = vsel %vm631_vm1, 1, %v4579_v0  ;;  %vm633_vm3 = vcmp.eq.s32.totalorder %v2754_v1, 2  ;;  %v650_v27 = vsel %vm634_vm2, 1, %v4579_v0 }
   0xc   :  { %380 = vperm.xlu1 %2627, %v353_v13   ;;  %377 = vperm.xlu0 %2626, %v352_v14   ;;  %v649_v28 = vsel %vm633_vm3, 1, %v4579_v0  ;;  %vm636_vm4 = vcmp.eq.s32.totalorder %v2780_v7, 2  ;;  %vm635_vm5 = vcmp.eq.s32.totalorder %v2785_v8, 2  ;;  %vm638_vm6 = vcmp.eq.s32.totalorder %v2794_v11, 2  ;;  %v2948_v13 = vld [vmem:[%s4559_s0 + $0x40] sm:$0xff]  ;;  %v2953_v14 = vld [vmem:[%s4559_s0 + $0x48] sm:$0xff] }
   0xd   :  { %v652_v29 = vsel %vm636_vm4, 1, %v4579_v0  ;;  %v651_v30 = vsel %vm635_vm5, 1, %v4579_v0  ;;  %vm637_vm7 = vcmp.eq.s32.totalorder %v2799_v12, 2  ;;  %v654_v35 = vsel %vm638_vm6, 1, %v4579_v0 }
   0xe   :  { %v653_v36 = vsel %vm637_vm7, 1, %v4579_v0  ;;  %v140_v37 = vmul.f32 %v2850_v33, %v2850_v33  ;;  %v141_v38 = vmul.f32 %v2855_v34, %v2855_v34  ;;  %vm341_vm8 = vcmp.eq.s32.totalorder %v2840_v31, 0 }
   0xf   :  { %vm340_vm9 = vcmp.eq.s32.totalorder %v2845_v32, 0  ;;  %v2571_v41 = vpack.c.bf16 %v2855_v34, %v2850_v33  ;;  %v357_v45 = vsel %vm341_vm8, 1, %v4579_v0  ;;  %v142_v48 = vmul.f32 %v2880_v43, %v2880_v43 }
  0x10   :  { %386 = vperm.xlu1 %2627, %v355_v15   ;;  %383 = vperm.xlu0 %2626, %v354_v16   ;;  %v2595_v42 = vpack.c.bf16 %v141_v38, %v140_v37  ;;  %v356_v46 = vsel %vm340_vm9, 1, %v4579_v0  ;;  %v143_v49 = vmul.f32 %v2885_v44, %v2885_v44  ;;  %vm343_vm10 = vcmp.eq.s32.totalorder %v2868_v39, 0 }
  0x11   :  { %vm342_vm11 = vcmp.eq.s32.totalorder %v2873_v40, 0  ;;  %2572 = vmatpush3.bf16.msra.mxu0 %v2571_v41  ;;  %v2574_v50 = vpack.c.bf16 %v2885_v44, %v2880_v43  ;;  %v359_v54 = vsel %vm343_vm10, 1, %v4579_v0  ;;  %v144_v56 = vmul.f32 %v2904_v52, %v2904_v52 }
  0x12   :  { %2596 = vmatpush3.bf16.msra.mxu1 %v2595_v42  ;;  %2573 = vmatprep.subr.bf16.mxu0 %v2702_v47  ;;  %v2598_v51 = vpack.c.bf16 %v143_v49, %v142_v48  ;;  %v358_v55 = vsel %vm342_vm11, 1, %v4579_v0  ;;  %v145_v57 = vmul.f32 %v2909_v53, %v2909_v53  ;;  %vm491_vm12 = vcmp.eq.s32.totalorder %v2840_v31, 1 }
  0x13   :  { %2597 = vmatprep.subr.bf16.mxu1 %v2702_v47  ;;  %vm490_vm13 = vcmp.eq.s32.totalorder %v2845_v32, 1  ;;  %v2577_v58 = vpack.c.bf16 %v2909_v53, %v2904_v52  ;;  %v507_v62 = vsel %vm491_vm12, 1, %v4579_v0  ;;  %v146_v5 = vmul.f32 %v2926_v60, %v2926_v60 }
  0x14   :  { %518 = vperm.xlu1 %2627, %v499_v17   ;;  %515 = vperm.xlu0 %2626, %v498_v18   ;;  %v2601_v59 = vpack.c.bf16 %v145_v57, %v144_v56  ;;  %v506_v63 = vsel %vm490_vm13, 1, %v4579_v0  ;;  %v147_v6 = vmul.f32 %v2931_v61, %v2931_v61  ;;  %vm493_vm14 = vcmp.eq.s32.totalorder %v2868_v39, 1 }
  0x15   :  { %2575 = vmatpush3.bf16.msra.mxu0 %v2574_v50  ;;  %vm492_vm15 = vcmp.eq.s32.totalorder %v2873_v40, 1  ;;  %v2580_v9 = vpack.c.bf16 %v2931_v61, %v2926_v60  ;;  %v509_v15 = vsel %vm493_vm14, 1, %v4579_v0  ;;  %v148_v17 = vmul.f32 %v2948_v13, %v2948_v13 }
  0x16   :  { %2599 = vmatpush3.bf16.msra.mxu1 %v2598_v51  ;;  %2576 = vmatprep.subr.bf16.mxu0 %v2702_v47  ;;  %v2604_v10 = vpack.c.bf16 %v147_v6, %v146_v5  ;;  %v508_v16 = vsel %vm492_vm15, 1, %v4579_v0  ;;  %v149_v18 = vmul.f32 %v2953_v14, %v2953_v14  ;;  %vm781_vm0 = vcmp.eq.s32.totalorder %v2772_v4, 3 }
  0x17   :  { %2600 = vmatprep.subr.bf16.mxu1 %v2702_v47  ;;  %vm780_vm1 = vcmp.eq.s32.totalorder %v2759_v2, 3  ;;  %vm783_vm2 = vcmp.eq.s32.totalorder %v2764_v3, 3  ;;  %vm782_vm3 = vcmp.eq.s32.totalorder %v2754_v1, 3  ;;  %vm785_vm4 = vcmp.eq.s32.totalorder %v2780_v7, 3 }
  0x18   :  { %524 = vperm.xlu1 %2627, %v501_v19   ;;  %521 = vperm.xlu0 %2626, %v500_v20   ;;  %v2583_v19 = vpack.c.bf16 %v2953_v14, %v2948_v13  ;;  %v2607_v20 = vpack.c.bf16 %v149_v18, %v148_v17  ;;  %vm784_vm5 = vcmp.eq.s32.totalorder %v2785_v8, 3  ;;  %v801_v48 = vsel %vm785_vm4, 1, %v4579_v0 }
  0x19   :  { %2578 = vmatpush3.bf16.msra.mxu0 %v2577_v58  ;;  %v800_v49 = vsel %vm784_vm5, 1, %v4579_v0  ;;  %vm787_vm6 = vcmp.eq.s32.totalorder %v2794_v11, 3  ;;  %vm786_vm7 = vcmp.eq.s32.totalorder %v2799_v12, 3  ;;  %v61_v56 = vlaneseq }
  0x1a   :  { %2602 = vmatpush3.bf16.msra.mxu1 %v2601_v59  ;;  %2579 = vmatprep.subr.bf16.mxu0 %v2702_v47  ;;  %v803_v57 = vsel %vm787_vm6, 1, %v4579_v0  ;;  %v802_v58 = vsel %vm786_vm7, 1, %v4579_v0  ;;  %vm4617_vm8 = vmmov 0   ;;  %v4566_v59 = vmov 0.0  }
  0x1b   :  { %2603 = vmatprep.subr.bf16.mxu1 %v2702_v47  ;;  %2472 = vmatprep.mubr.msk.f32.mxu0 %vm4617_vm8, %v4566_v59  ;;  %vm640_vm9 = vcmp.eq.s32.totalorder %v2840_v31, 2  ;;  %vm639_vm10 = vcmp.eq.s32.totalorder %v2845_v32, 2  ;;  %v2705_v6 = vmov 1.0   ;;  %vm642_vm12 = vcmp.eq.s32.totalorder %v2868_v39, 2 }
  0x1c   :  { %530 = vperm.xlu1 %2627, %v503_v21   ;;  %527 = vperm.xlu0 %2626, %v502_v22   ;;  %v2970_v21 = vld [vmem:[%s4559_s0 + $0x50] sm:$0xff]  ;;  %v2975_v22 = vld [vmem:[%s4559_s0 + $0x58] sm:$0xff]  ;;  %v655_v5 = vsel %vm639_vm10, 1, %v4579_v0  ;;  %vm641_vm13 = vcmp.eq.s32.totalorder %v2873_v40, 2  ;;  %vm930_vm14 = vcmp.eq.s32.totalorder %v2772_v4, 4  ;;  %vm929_vm15 = vcmp.eq.s32.totalorder %v2759_v2, 4 }
  0x1d   :  { %2581 = vmatpush3.bf16.msra.mxu0 %v2580_v9  ;;  %2507 = vmatprep.mubr.msk.f32.mxu1 %vm4617_vm8, %v4566_v59  ;;  %v658_v9 = vsel %vm642_vm12, 1, %v4579_v0  ;;  %vm936_vm4 = vcmp.eq.s32.totalorder %v2794_v11, 4  ;;  %vm935_vm5 = vcmp.eq.s32.totalorder %v2799_v12, 4 }
  0x1e   :  { %2605 = vmatpush3.bf16.msra.mxu1 %v2604_v10  ;;  %2582 = vmatprep.subr.bf16.mxu0 %v2702_v47  ;;  %v657_v10 = vsel %vm641_vm13, 1, %v4579_v0 }
  0x1f   :  { %2606 = vmatprep.subr.bf16.mxu1 %v2702_v47 }
  0x20   :  { %536 = vperm.xlu1 %2627, %v505_v23   ;;  %533 = vperm.xlu0 %2626, %v504_v24   ;;  %v797_v23 = vsel %vm781_vm0, 1, %v4579_v0  ;;  %v796_v24 = vsel %vm780_vm1, 1, %v4579_v0  ;;  %vm932_vm0 = vcmp.eq.s32.totalorder %v2764_v3, 4  ;;  %vm931_vm1 = vcmp.eq.s32.totalorder %v2754_v1, 4 }
  0x21   :  { %2584 = vmatpush3.bf16.msra.mxu0 %v2583_v19  ;;  %v948_v17 = vsel %vm932_vm0, 1, %v4579_v0  ;;  %v947_v18 = vsel %vm931_vm1, 1, %v4579_v0  ;;  %vm788_vm0 = vcmp.eq.s32.totalorder %v2845_v32, 3  ;;  %vm791_vm1 = vcmp.eq.s32.totalorder %v2868_v39, 3 }
  0x22   :  { %2608 = vmatpush3.bf16.msra.mxu1 %v2607_v20  ;;  %2585 = vmatprep.subr.bf16.mxu0 %v2702_v47 }
  0x23   :  { %2609 = vmatprep.subr.bf16.mxu1 %v2702_v47 }
  0x24   :  { %667 = vperm.xlu1 %2627, %v648_v25   ;;  %664 = vperm.xlu0 %2626, %v647_v26   ;;  %v150_v25 = vmul.f32 %v2970_v21, %v2970_v21  ;;  %v151_v26 = vmul.f32 %v2975_v22, %v2975_v22 }
  0x28   :  { %673 = vperm.xlu1 %2627, %v650_v27   ;;  %670 = vperm.xlu0 %2626, %v649_v28   ;;  %v2586_v27 = vpack.c.bf16 %v2975_v22, %v2970_v21  ;;  %v2610_v28 = vpack.c.bf16 %v151_v26, %v150_v25  ;;  %v952_v25 = vsel %vm936_vm4, 1, %v4579_v0  ;;  %v951_v26 = vsel %vm935_vm5, 1, %v4579_v0 }
  0x29   :  { %vm1078_vm4 = vcmp.eq.s32.totalorder %v2759_v2, 5  ;;  %vm1081_vm5 = vcmp.eq.s32.totalorder %v2764_v3, 5 }
  0x2a   :  { %2587 = vmatpush3.bf16.msra.mxu0 %v2586_v27  ;;  %2611 = vmatpush3.bf16.msra.mxu1 %v2610_v28  ;;  %v3085_v27 = vld [vmem:[%s4558_s2 + $0x78] sm:$0xff]  ;;  %v3090_v28 = vld [vmem:[%s4558_s2 + $0x70] sm:$0xff] }
  0x2b   :  { %2588 = vmatprep.subr.bf16.mxu0 %v2702_v47  ;;  %2612 = vmatprep.subr.bf16.mxu1 %v2702_v47  ;;  %vm346_vm10 = vcmp.eq.s32.totalorder %v3090_v28, 0  ;;  %vm497_vm13 = vcmp.eq.s32.totalorder %v3085_v27, 1 }
  0x2c   :  { %679 = vperm.xlu1 %2627, %v652_v29   ;;  %676 = vperm.xlu0 %2626, %v651_v30   ;;  %v2992_v29 = vld [vmem:[%s4559_s0 + $0x60] sm:$0xff]  ;;  %v2997_v30 = vld [vmem:[%s4559_s0 + $0x68] sm:$0xff] }
  0x2d   :  { %v152_v37 = vmul.f32 %v2992_v29, %v2992_v29  ;;  %v153_v38 = vmul.f32 %v2997_v30, %v2997_v30  ;;  %v2589_v41 = vpack.c.bf16 %v2997_v30, %v2992_v29 }
  0x2f   :  { %v2613_v42 = vpack.c.bf16 %v153_v38, %v152_v37  ;;  %2590 = vmatpush3.bf16.msra.mxu0 %v2589_v41  ;;  %v362_v38 = vsel %vm346_vm10, 1, %v4579_v0  ;;  %vm1085_vm10 = vcmp.eq.s32.totalorder %v2794_v11, 5 }
  0x30   :  { %685 = vperm.xlu1 %2627, %v654_v35   ;;  %682 = vperm.xlu0 %2626, %v653_v36   ;;  %v799_v35 = vsel %vm783_vm2, 1, %v4579_v0  ;;  %v798_v36 = vsel %vm782_vm3, 1, %v4579_v0  ;;  %vm934_vm2 = vcmp.eq.s32.totalorder %v2780_v7, 4  ;;  %vm933_vm3 = vcmp.eq.s32.totalorder %v2785_v8, 4 }
  0x31   :  { %2614 = vmatpush3.bf16.msra.mxu1 %v2613_v42  ;;  %2591 = vmatprep.subr.bf16.mxu0 %v2702_v47  ;;  %v950_v19 = vsel %vm934_vm2, 1, %v4579_v0  ;;  %v949_v20 = vsel %vm933_vm3, 1, %v4579_v0  ;;  %vm790_vm2 = vcmp.eq.s32.totalorder %v2873_v40, 3  ;;  %vm1079_vm3 = vcmp.eq.s32.totalorder %v2772_v4, 5 }
  0x32   :  { %2615 = vmatprep.subr.bf16.mxu1 %v2702_v47  ;;  %v2302_v47 = vld [vmem:[%s4560_s1] ss:$0 sm:$0xff] }
  0x34   :  { %392 = vperm.xlu1 %2627, %v357_v45   ;;  %389 = vperm.xlu0 %2626, %v356_v46   ;;  %v3014_v45 = vld [vmem:[%s4559_s0 + $0x70] sm:$0xff]  ;;  %v3019_v46 = vld [vmem:[%s4559_s0 + $0x78] sm:$0xff] }
  0x35   :  { %v154_v50 = vmul.f32 %v3014_v45, %v3014_v45  ;;  %v155_v51 = vmul.f32 %v3019_v46, %v3019_v46 }
  0x38   :  { %398 = vperm.xlu1 %2627, %v359_v54   ;;  %395 = vperm.xlu0 %2626, %v358_v55   ;;  %v2592_v54 = vpack.c.bf16 %v3019_v46, %v3014_v45  ;;  %v2616_v55 = vpack.c.bf16 %v155_v51, %v154_v50  ;;  %v804_v51 = vsel %vm788_vm0, 1, %v4579_v0  ;;  %vm938_vm0 = vcmp.eq.s32.totalorder %v2840_v31, 4 }
  0x3a   :  { %2593 = vmatpush3.bf16.msra.mxu0 %v2592_v54  ;;  %2617 = vmatpush3.bf16.msra.mxu1 %v2616_v55  ;;  %v807_v54 = vsel %vm791_vm1, 1, %v4579_v0  ;;  %v806_v55 = vsel %vm790_vm2, 1, %v4579_v0  ;;  %vm937_vm1 = vcmp.eq.s32.totalorder %v2845_v32, 4  ;;  %vm940_vm2 = vcmp.eq.s32.totalorder %v2868_v39, 4 }
  0x3c   :  { %542 = vperm.xlu1 %2627, %v507_v62   ;;  %539 = vperm.xlu0 %2626, %v506_v63   ;;  %v3044_v62 = vshrl.u32 %v61_v56, 7  ;;  %v656_v63 = vsel %vm640_vm9, 1, %v4579_v0  ;;  %vm347_vm9 = vcmp.eq.s32.totalorder %v3085_v27, 0  ;;  %v1095_v56 = vsel %vm1079_vm3, 1, %v4579_v0 }
  0x3d   :  { %v363_v37 = vsel %vm347_vm9, 1, %v4579_v0  ;;  %vm1082_vm9 = vcmp.eq.s32.totalorder %v2785_v8, 5  ;;  %vm939_vm3 = vcmp.eq.s32.totalorder %v2873_v40, 4 }
  0x3e   :  { %4629 = vst [vmem:[#allocation2_spill] sm:$0xff] %v3044_v62  ;;  %vm67_vm11 = vcmp.eq.s32.totalorder %v3044_v62, %v2302_v47 }
  0x3f   :  { %2473 = vmatmul.mubr.msk.f32.vlgmr.msra.gmra.mrb[0].mxu0 %vm67_vm11, %v2705_v6  ;;  %2508 = vmatmul.mubr.msk.f32.vlgmr.msra.gmra.mrb[0].mxu1 %vm67_vm11, %v2705_v6 }
  0x40   :  { %548 = vperm.xlu1 %2627, %v509_v15   ;;  %545 = vperm.xlu0 %2626, %v508_v16   ;;  %v946_v15 = vsel %vm930_vm14, 1, %v4579_v0  ;;  %v945_v16 = vsel %vm929_vm15, 1, %v4579_v0  ;;  %vm496_vm14 = vcmp.eq.s32.totalorder %v3090_v28, 1  ;;  %vm789_vm15 = vcmp.eq.s32.totalorder %v2840_v31, 3 }
  0x41   :  { %1693 = vmatprep.mubr.bf16.mxu0 %v4579_v0  ;;  %v805_v50 = vsel %vm789_vm15, 1, %v4579_v0  ;;  %vm645_vm15 = vcmp.eq.s32.totalorder %v3090_v28, 2 }
  0x44   :  { %816 = vperm.xlu1 %2627, %v797_v23   ;;  %813 = vperm.xlu0 %2626, %v796_v24   ;;  %v3071_v23 = vld [vmem:[%s4558_s2 + $0x68] sm:$0xff]  ;;  %v3076_v24 = vld [vmem:[%s4558_s2 + $0x60] sm:$0xff]  ;;  %s2706_s2 = smov 32  }
  0x45   :  { %vm345_vm6 = vcmp.eq.s32.totalorder %v3071_v23, 0  ;;  %vm344_vm7 = vcmp.eq.s32.totalorder %v3076_v24, 0  ;;  %vm495_vm11 = vcmp.eq.s32.totalorder %v3071_v23, 1  ;;  %vm494_vm12 = vcmp.eq.s32.totalorder %v3076_v24, 1 }
  0x46   :  { %v511_v41 = vsel %vm495_vm11, 1, %v4579_v0  ;;  %v510_v42 = vsel %vm494_vm12, 1, %v4579_v0  ;;  %vm1084_vm11 = vcmp.eq.s32.totalorder %v2799_v12, 5  ;;  %vm644_vm12 = vcmp.eq.s32.totalorder %v3071_v23, 2 }
  0x48   :  { %822 = vperm.xlu1 %2627, %v799_v35   ;;  %819 = vperm.xlu0 %2626, %v798_v36   ;;  %v361_v35 = vsel %vm345_vm6, 1, %v4579_v0  ;;  %v360_v36 = vsel %vm344_vm7, 1, %v4579_v0  ;;  %vm1080_vm6 = vcmp.eq.s32.totalorder %v2754_v1, 5  ;;  %vm1083_vm7 = vcmp.eq.s32.totalorder %v2780_v7, 5 }
  0x4c   :  { %828 = vperm.xlu1 %2627, %v801_v48   ;;  %825 = vperm.xlu0 %2626, %v800_v49   ;;  %v513_v48 = vsel %vm497_vm13, 1, %v4579_v0  ;;  %v512_v49 = vsel %vm496_vm14, 1, %v4579_v0  ;;  %vm643_vm13 = vcmp.eq.s32.totalorder %v3076_v24, 2  ;;  %vm646_vm14 = vcmp.eq.s32.totalorder %v3085_v27, 2 }
  0x50   :  { %834 = vperm.xlu1 %2627, %v803_v57   ;;  %831 = vperm.xlu0 %2626, %v802_v58   ;;  %v1094_v57 = vsel %vm1078_vm4, 1, %v4579_v0  ;;  %vm1228_vm4 = vcmp.eq.s32.totalorder %v2772_v4, 6 }
  0x54   :  { %691 = vperm.xlu1 %2627, %v656_v63   ;;  %688 = vperm.xlu0 %2626, %v655_v5   ;;  %v1097_v63 = vsel %vm1081_vm5, 1, %v4579_v0  ;;  %v1096_v5 = vsel %vm1080_vm6, 1, %v4579_v0  ;;  %vm1227_vm5 = vcmp.eq.s32.totalorder %v2759_v2, 6  ;;  %vm1230_vm6 = vcmp.eq.s32.totalorder %v2764_v3, 6 }
  0x58   :  { %697 = vperm.xlu1 %2627, %v658_v9   ;;  %694 = vperm.xlu0 %2626, %v657_v10   ;;  %v1099_v10 = vsel %vm1083_vm7, 1, %v4579_v0  ;;  %vm1229_vm7 = vcmp.eq.s32.totalorder %v2754_v1, 6 }
  0x5c   :  { %965 = vperm.xlu1 %2627, %v946_v15   ;;  %962 = vperm.xlu0 %2626, %v945_v16   ;;  %v1098_v15 = vsel %vm1082_vm9, 1, %v4579_v0  ;;  %vm1232_vm9 = vcmp.eq.s32.totalorder %v2780_v7, 6 }
  0x60   :  { %971 = vperm.xlu1 %2627, %v948_v17   ;;  %968 = vperm.xlu0 %2626, %v947_v18   ;;  %v1101_v18 = vsel %vm1085_vm10, 1, %v4579_v0  ;;  %vm1231_vm10 = vcmp.eq.s32.totalorder %v2785_v8, 6 }
  0x64   :  { %977 = vperm.xlu1 %2627, %v950_v19   ;;  %974 = vperm.xlu0 %2626, %v949_v20   ;;  %v1100_v19 = vsel %vm1084_vm11, 1, %v4579_v0  ;;  %vm1234_vm11 = vcmp.eq.s32.totalorder %v2794_v11, 6 }
  0x68   :  { %983 = vperm.xlu1 %2627, %v952_v25   ;;  %980 = vperm.xlu0 %2626, %v951_v26   ;;  %v660_v26 = vsel %vm644_vm12, 1, %v4579_v0  ;;  %vm1233_vm12 = vcmp.eq.s32.totalorder %v2799_v12, 6 }
  0x6c   :  { %404 = vperm.xlu1 %2627, %v361_v35   ;;  %401 = vperm.xlu0 %2626, %v360_v36   ;;  %v659_v35 = vsel %vm643_vm13, 1, %v4579_v0  ;;  %vm793_vm13 = vcmp.eq.s32.totalorder %v3071_v23, 3 }
  0x70   :  { %410 = vperm.xlu1 %2627, %v363_v37   ;;  %407 = vperm.xlu0 %2626, %v362_v38   ;;  %v662_v38 = vsel %vm646_vm14, 1, %v4579_v0  ;;  %vm792_vm14 = vcmp.eq.s32.totalorder %v3076_v24, 3 }
  0x71   :  { %v808_v59 = vsel %vm792_vm14, 1, %v4579_v0  ;;  %vm942_vm14 = vcmp.eq.s32.totalorder %v3071_v23, 4 }
  0x74   :  { %554 = vperm.xlu1 %2627, %v511_v41   ;;  %551 = vperm.xlu0 %2626, %v510_v42   ;;  %v661_v41 = vsel %vm645_vm15, 1, %v4579_v0  ;;  %vm795_vm15 = vcmp.eq.s32.totalorder %v3085_v27, 3 }
  0x75   :  { %v811_v62 = vsel %vm795_vm15, 1, %v4579_v0  ;;  %vm941_vm15 = vcmp.eq.s32.totalorder %v3076_v24, 4 }
  0x78   :  { %560 = vperm.xlu1 %2627, %v513_v48   ;;  %557 = vperm.xlu0 %2626, %v512_v49   ;;  %v954_v49 = vsel %vm938_vm0, 1, %v4579_v0  ;;  %vm794_vm0 = vcmp.eq.s32.totalorder %v3090_v28, 3 }
  0x7c   :  { %840 = vperm.xlu1 %2627, %v805_v50   ;;  %837 = vperm.xlu0 %2626, %v804_v51   ;;  %v953_v50 = vsel %vm937_vm1, 1, %v4579_v0  ;;  %vm1087_vm1 = vcmp.eq.s32.totalorder %v2840_v31, 5 }
  0x80   :  { %846 = vperm.xlu1 %2627, %v807_v54   ;;  %843 = vperm.xlu0 %2626, %v806_v55   ;;  %v956_v55 = vsel %vm940_vm2, 1, %v4579_v0  ;;  %vm1086_vm2 = vcmp.eq.s32.totalorder %v2845_v32, 5 }
  0x83   :  { %v3120_v58 = vpop.permute.xlu1 %371  ;;  %v3122_v47 = vpop.permute.xlu0 %365 }
  0x84   :  { %1114 = vperm.xlu1 %2627, %v1095_v56   ;;  %1111 = vperm.xlu0 %2626, %v1094_v57   ;;  %v955_v56 = vsel %vm939_vm3, 1, %v4579_v0  ;;  %vm1089_vm3 = vcmp.eq.s32.totalorder %v2868_v39, 5 }
  0x87   :  { %v3128_v6 = vpop.permute.xlu1 %374  ;;  %v3130_v9 = vpop.permute.xlu0 %368 }
  0x88   :  { %1120 = vperm.xlu1 %2627, %v1097_v63   ;;  %1117 = vperm.xlu0 %2626, %v1096_v5   ;;  %v1244_v5 = vsel %vm1228_vm4, 1, %v4579_v0  ;;  %vm1088_vm4 = vcmp.eq.s32.totalorder %v2873_v40, 5 }
  0x8b   :  { %v3136_v16 = vpop.permute.xlu1 %380  ;;  %v3138_v17 = vpop.permute.xlu0 %377 }
  0x8c   :  { %1126 = vperm.xlu1 %2627, %v1099_v10   ;;  %1123 = vperm.xlu0 %2626, %v1098_v15   ;;  %v1243_v10 = vsel %vm1227_vm5, 1, %v4579_v0  ;;  %vm1377_vm5 = vcmp.eq.s32.totalorder %v2772_v4, 7 }
  0x8f   :  { %v3144_v20 = vpop.permute.xlu1 %386  ;;  %v3146_v25 = vpop.permute.xlu0 %383 }
  0x90   :  { %4630 = vst [vmem:[#allocation3_spill] sm:$0xff] %v3146_v25  ;;  %1132 = vperm.xlu1 %2627, %v1101_v18   ;;  %1129 = vperm.xlu0 %2626, %v1100_v19   ;;  %v1246_v19 = vsel %vm1230_vm6, 1, %v4579_v0  ;;  %vm1376_vm6 = vcmp.eq.s32.totalorder %v2759_v2, 7  ;;  %v2631_v25 = vld [vmem:[%s4562_s5 + $0x10] ss:$8 sps:$4 sm:$0xff]  }
  0x93   :  { %v3152_v36 = vpop.permute.xlu1 %518  ;;  %v3154_v37 = vpop.permute.xlu0 %515 }
  0x94   :  { %703 = vperm.xlu1 %2627, %v660_v26   ;;  %700 = vperm.xlu0 %2626, %v659_v35   ;;  %v1245_v26 = vsel %vm1229_vm7, 1, %v4579_v0  ;;  %vm1379_vm7 = vcmp.eq.s32.totalorder %v2764_v3, 7 }
  0x95   :  { %v1395_v2 = vsel %vm1379_vm7, 1, %v4579_v0  ;;  %vm1090_vm7 = vcmp.eq.s32.totalorder %v3076_v24, 5 }
  0x97   :  { %v3160_v42 = vpop.permute.xlu1 %524  ;;  %v3162_v48 = vpop.permute.xlu0 %521 }
  0x98   :  { %709 = vperm.xlu1 %2627, %v662_v38   ;;  %706 = vperm.xlu0 %2626, %v661_v41   ;;  %v1248_v41 = vsel %vm1232_vm9, 1, %v4579_v0  ;;  %vm1378_vm9 = vcmp.eq.s32.totalorder %v2754_v1, 7 }
  0x99   :  { %v1394_v4 = vsel %vm1378_vm9, 1, %v4579_v0  ;;  %vm1093_vm9 = vcmp.eq.s32.totalorder %v3085_v27, 5 }
  0x9b   :  { %v3168_v51 = vpop.permute.xlu1 %530  ;;  %v3170_v54 = vpop.permute.xlu0 %527 }
  0x9c   :  { %989 = vperm.xlu1 %2627, %v954_v49   ;;  %986 = vperm.xlu0 %2626, %v953_v50   ;;  %v1247_v49 = vsel %vm1231_vm10, 1, %v4579_v0  ;;  %vm1381_vm10 = vcmp.eq.s32.totalorder %v2780_v7, 7 }
  0x9d   :  { %v1397_v1 = vsel %vm1381_vm10, 1, %v4579_v0  ;;  %vm1092_vm10 = vcmp.eq.s32.totalorder %v3090_v28, 5 }
  0x9f   :  { %v3176_v57 = vpop.permute.xlu1 %536  ;;  %v3178_v63 = vpop.permute.xlu0 %533 }
  0xa0   :  { %4631 = vst [vmem:[#allocation4_spill] sm:$0xff] %v3178_v63  ;;  %995 = vperm.xlu1 %2627, %v956_v55   ;;  %992 = vperm.xlu0 %2626, %v955_v56   ;;  %v1250_v56 = vsel %vm1234_vm11, 1, %v4579_v0  ;;  %vm1380_vm11 = vcmp.eq.s32.totalorder %v2785_v8, 7 }
  0xa1   :  { %v1396_v3 = vsel %vm1380_vm11, 1, %v4579_v0  ;;  %vm1385_vm11 = vcmp.eq.s32.totalorder %v2840_v31, 7 }
  0xa3   :  { %v3184_v15 = vpop.permute.xlu1 %667  ;;  %v3186_v18 = vpop.permute.xlu0 %664 }
  0xa4   :  { %1263 = vperm.xlu1 %2627, %v1244_v5   ;;  %1260 = vperm.xlu0 %2626, %v1243_v10   ;;  %v1249_v5 = vsel %vm1233_vm12, 1, %v4579_v0  ;;  %vm1383_vm12 = vcmp.eq.s32.totalorder %v2794_v11, 7  ;;  %v236_v11 = vsub.f32 0.0, %v2855_v34  ;;  %v239_v34 = vsub.f32 0.0, %v2904_v52 }
  0xa5   :  { %v1399_v7 = vsel %vm1383_vm12, 1, %v4579_v0  ;;  %v4648_v52 = vmov 0   ;;  %vm1384_vm12 = vcmp.eq.s32.totalorder %v2845_v32, 7 }
  0xa7   :  { %v3192_v35 = vpop.permute.xlu1 %673  ;;  %v3194_v38 = vpop.permute.xlu0 %670 }
  0xa8   :  { %1269 = vperm.xlu1 %2627, %v1246_v19   ;;  %1266 = vperm.xlu0 %2626, %v1245_v26   ;;  %v809_v26 = vsel %vm793_vm13, 1, %v4579_v0  ;;  %vm1382_vm13 = vcmp.eq.s32.totalorder %v2799_v12, 7  ;;  %v235_v12 = vsub.f32 0.0, %v2850_v33  ;;  %v240_v33 = vsub.f32 0.0, %v2909_v53 }
  0xa9   :  { %v1398_v8 = vsel %vm1382_vm13, 1, %v4579_v0  ;;  %vm1387_vm13 = vcmp.eq.s32.totalorder %v2868_v39, 7 }
  0xab   :  { %v3200_v50 = vpop.permute.xlu1 %679  ;;  %v3202_v55 = vpop.permute.xlu0 %676 }
  0xac   :  { %1275 = vperm.xlu1 %2627, %v1248_v41   ;;  %1272 = vperm.xlu0 %2626, %v1247_v49  }
  0xaf   :  { %v3208_v10 = vpop.permute.xlu1 %685  ;;  %v3210_v19 = vpop.permute.xlu0 %682 }
  0xb0   :  { %4632 = vst [vmem:[#allocation5_spill] sm:$0xff] %v3208_v10  ;;  %4633 = vst [vmem:[#allocation6_spill] sm:$0xff] %v3210_v19  ;;  %1281 = vperm.xlu1 %2627, %v1250_v56   ;;  %1278 = vperm.xlu0 %2626, %v1249_v5   ;;  %v810_v19 = vsel %vm794_vm0, 1, %v4579_v0  ;;  %vm944_vm0 = vcmp.eq.s32.totalorder %v3085_v27, 4 }
  0xb3   :  { %v3216_v41 = vpop.permute.xlu1 %392  ;;  %v3218_v49 = vpop.permute.xlu0 %389 }
  0xb4   :  { %4634 = vst [vmem:[#allocation7_spill] sm:$0xff] %v3216_v41  ;;  %4635 = vst [vmem:[#allocation8_spill] sm:$0xff] %v3218_v49  ;;  %852 = vperm.xlu1 %2627, %v809_v26   ;;  %849 = vperm.xlu0 %2626, %v808_v59   ;;  %v1103_v41 = vsel %vm1087_vm1, 1, %v4579_v0  ;;  %v1102_v49 = vsel %vm1086_vm2, 1, %v4579_v0  ;;  %vm943_vm1 = vcmp.eq.s32.totalorder %v3090_v28, 4  ;;  %vm1236_vm2 = vcmp.eq.s32.totalorder %v2840_v31, 6 }
  0xb5   :  { %v1403_v31 = vsel %vm1387_vm13, 1, %v4648_v52 }
  0xb7   :  { %v3224_v56 = vpop.permute.xlu1 %398  ;;  %v3226_v5 = vpop.permute.xlu0 %395 }
  0xb8   :  { %4636 = vst [vmem:[#allocation9_spill] sm:$0xff] %v3224_v56  ;;  %4637 = vst [vmem:[#allocation10_spill] sm:$0xff] %v3226_v5  ;;  %858 = vperm.xlu1 %2627, %v811_v62   ;;  %855 = vperm.xlu0 %2626, %v810_v19   ;;  %v1105_v56 = vsel %vm1089_vm3, 1, %v4579_v0  ;;  %v1104_v5 = vsel %vm1088_vm4, 1, %v4579_v0  ;;  %vm1235_vm3 = vcmp.eq.s32.totalorder %v2845_v32, 6  ;;  %vm1238_vm4 = vcmp.eq.s32.totalorder %v2868_v39, 6 }
  0xb9   :  { %v244_v39 = vsub.f32 0.0, %v2953_v14 }
  0xbb   :  { %v3232_v59 = vpop.permute.xlu1 %542  ;;  %v3234_v26 = vpop.permute.xlu0 %539 }
  0xbc   :  { %4638 = vst [vmem:[#allocation11_spill] sm:$0xff] %v3232_v59  ;;  %4639 = vst [vmem:[#allocation12_spill] sm:$0xff] %v3234_v26  ;;  %1138 = vperm.xlu1 %2627, %v1103_v41   ;;  %1135 = vperm.xlu0 %2626, %v1102_v49   ;;  %v1393_v59 = vsel %vm1377_vm5, 1, %v4579_v0  ;;  %v1392_v26 = vsel %vm1376_vm6, 1, %v4579_v0  ;;  %vm1237_vm5 = vcmp.eq.s32.totalorder %v2873_v40, 6  ;;  %vm1091_vm6 = vcmp.eq.s32.totalorder %v3071_v23, 5 }
  0xbf   :  { %v3240_v62 = vpop.permute.xlu1 %548  ;;  %v3242_v19 = vpop.permute.xlu0 %545 }
  0xc0   :  { %4640 = vst [vmem:[#allocation13_spill] sm:$0xff] %v3240_v62  ;;  %4641 = vst [vmem:[#allocation14_spill] sm:$0xff] %v3242_v19  ;;  %1144 = vperm.xlu1 %2627, %v1105_v56   ;;  %1141 = vperm.xlu0 %2626, %v1104_v5  }
  0xc3   :  { %v3248_v41 = vpop.permute.xlu1 %816  ;;  %v3250_v49 = vpop.permute.xlu0 %813 }
  0xc4   :  { %1412 = vperm.xlu1 %2627, %v1393_v59   ;;  %1409 = vperm.xlu0 %2626, %v1392_v26  }
  0xc7   :  { %v3256_v56 = vpop.permute.xlu1 %822  ;;  %v3258_v5 = vpop.permute.xlu0 %819 }
  0xc8   :  { %1418 = vperm.xlu1 %2627, %v1395_v2   ;;  %1415 = vperm.xlu0 %2626, %v1394_v4  }
  0xcb   :  { %v3264_v59 = vpop.permute.xlu1 %828  ;;  %v3266_v26 = vpop.permute.xlu0 %825 }
  0xcc   :  { %1424 = vperm.xlu1 %2627, %v1397_v1   ;;  %1421 = vperm.xlu0 %2626, %v1396_v3   ;;  %v238_v1 = vsub.f32 0.0, %v2885_v44  ;;  %v237_v3 = vsub.f32 0.0, %v2880_v43  ;;  %v242_v43 = vsub.f32 0.0, %v2931_v61  ;;  %v241_v44 = vsub.f32 0.0, %v2926_v60 }
  0xcf   :  { %v3270_v2 = vpop.permute.xlu1 %834  ;;  %v3272_v4 = vpop.permute.xlu0 %831 }
  0xd0   :  { %4642 = vst [vmem:[#allocation15_spill] sm:$0xff] %v3270_v2  ;;  %4643 = vst [vmem:[#allocation16_spill] sm:$0xff] %v3272_v4  ;;  %1430 = vperm.xlu1 %2627, %v1399_v7   ;;  %1427 = vperm.xlu0 %2626, %v1398_v8  }
  0xd3   :  { %v3276_v19 = vpop.permute.xlu1 %691  ;;  %v3278_v62 = vpop.permute.xlu0 %688 }
  0xd4   :  { %4644 = vst [vmem:[#allocation17_spill] sm:$0xff] %v3276_v19  ;;  %4645 = vst [vmem:[#allocation18_spill] sm:$0xff] %v3278_v62  ;;  %269 = vrot.lane.b32.xlu1 %v236_v11, %s2706_s2  ;;  %267 = vrot.lane.b32.xlu0 %v235_v12, %s2706_s2  ;;  %v1254_v62 = vsel %vm1238_vm4, 1, %v4648_v52  ;;  %v1253_v19 = vsel %vm1237_vm5, 1, %v4648_v52  ;;  %vm1388_vm4 = vcmp.eq.s32.totalorder %v3076_v24, 7  ;;  %vm1391_vm5 = vcmp.eq.s32.totalorder %v3085_v27, 7 }
  0xd7   :  { %v3284_v0 = vpop.permute.xlu1 %697  ;;  %v3286_v7 = vpop.permute.xlu0 %694 }
  0xd8   :  { %4646 = vst [vmem:[#allocation19_spill] sm:$0xff] %v3284_v0  ;;  %4647 = vst [vmem:[#allocation20_spill] sm:$0xff] %v3286_v7  ;;  %273 = vrot.lane.b32.xlu1 %v238_v1, %s2706_s2  ;;  %271 = vrot.lane.b32.xlu0 %v237_v3, %s2706_s2  ;;  %v958_v1 = vsel %vm942_vm14, 1, %v4648_v52  ;;  %v957_v3 = vsel %vm941_vm15, 1, %v4648_v52  ;;  %v1252_v7 = vsel %vm1236_vm2, 1, %v4648_v52  ;;  %v1251_v0 = vsel %vm1235_vm3, 1, %v4648_v52 }
  0xd9   :  { %vm1386_vm14 = vcmp.eq.s32.totalorder %v2873_v40, 7  ;;  %v243_v40 = vsub.f32 0.0, %v2948_v13  ;;  %vm1240_vm15 = vcmp.eq.s32.totalorder %v3071_v23, 6  ;;  %vm1241_vm2 = vcmp.eq.s32.totalorder %v3090_v28, 6 }
  0xda   :  { %v1402_v32 = vsel %vm1386_vm14, 1, %v4648_v52  ;;  %v1256_v13 = vsel %vm1240_vm15, 1, %v4648_v52  ;;  %vm1389_vm3 = vcmp.eq.s32.totalorder %v3071_v23, 7  ;;  %v1407_v23 = vsel %vm1391_vm5, 1, %v4648_v52 }
  0xdb   :  { %v3292_v8 = vpop.permute.xlu1 %965  ;;  %v3294_v11 = vpop.permute.xlu0 %962  ;;  %vm861_vm14 = vcmp.eq.s32.totalorder %v3248_v41, 1 }
  0xdc   :  { %277 = vrot.lane.b32.xlu1 %v240_v33, %s2706_s2  ;;  %275 = vrot.lane.b32.xlu0 %v239_v34, %s2706_s2  ;;  %v960_v33 = vsel %vm944_vm0, 1, %v4648_v52  ;;  %v959_v34 = vsel %vm943_vm1, 1, %v4648_v52  ;;  %vm1239_vm0 = vcmp.eq.s32.totalorder %v3076_v24, 6  ;;  %vm1242_vm1 = vcmp.eq.s32.totalorder %v3085_v27, 6 }
  0xdd   :  { %v247_v27 = vsub.f32 0.0, %v2992_v29  ;;  %v60_v29 = vld [vmem:[%s4561_s4] sm:$0xff] }
  0xdf   :  { %v3302_v12 = vpop.permute.xlu1 %971  ;;  %v3304_v53 = vpop.permute.xlu0 %968 }
  0xe0   :  { %281 = vrot.lane.b32.xlu1 %v242_v43, %s2706_s2  ;;  %279 = vrot.lane.b32.xlu0 %v241_v44, %s2706_s2 }
  0xe3   :  { %v3312_v60 = vpop.permute.xlu1 %977  ;;  %v3314_v61 = vpop.permute.xlu0 %974 }
  0xe4   :  { %1001 = vperm.xlu1 %2627, %v958_v1   ;;  %998 = vperm.xlu0 %2626, %v957_v3  }
  0xe7   :  { %v3320_v43 = vpop.permute.xlu1 %983  ;;  %v3322_v44 = vpop.permute.xlu0 %980 }
  0xe8   :  { %4649 = vst [vmem:[#allocation21_spill] sm:$0xff] %v3320_v43  ;;  %4650 = vst [vmem:[#allocation22_spill] sm:$0xff] %v3322_v44  ;;  %1007 = vperm.xlu1 %2627, %v960_v33   ;;  %1004 = vperm.xlu0 %2626, %v959_v34   ;;  %v2685_v44 = vld [vmem:[%s4559_s0 + $0x8] sm:$0xff] }
  0xeb   :  { %v3328_v1 = vpop.permute.xlu1 %404  ;;  %v3330_v3 = vpop.permute.xlu0 %401 }
  0xec   :  { %4651 = vst [vmem:[#allocation23_spill] sm:$0xff] %v3328_v1  ;;  %4652 = vst [vmem:[#allocation24_spill] sm:$0xff] %v3330_v3  ;;  %1287 = vperm.xlu1 %2627, %v1252_v7   ;;  %1284 = vperm.xlu0 %2626, %v1251_v0   ;;  %v1107_v1 = vsel %vm1091_vm6, 1, %v4648_v52  ;;  %v1106_v3 = vsel %vm1090_vm7, 1, %v4648_v52  ;;  %vm1390_vm6 = vcmp.eq.s32.totalorder %v3090_v28, 7  ;;  %v248_v28 = vsub.f32 0.0, %v2997_v30 }
  0xed   :  { %v1406_v24 = vsel %vm1390_vm6, 1, %v4648_v52  ;;  %vm413_vm7 = vcmp.eq.s32.totalorder %v3130_v9, 1  ;;  %vm1009_vm6 = vcmp.eq.s32.totalorder %v3294_v11, 1  ;;  %v2686_v9 = vld [vmem:[%s4559_s0] sm:$0xff]  ;;  %v2687_v11 = vld [vmem:[%s4559_s0 + $0x18] sm:$0xff] }
  0xef   :  { %v3336_v33 = vpop.permute.xlu1 %410  ;;  %v3338_v34 = vpop.permute.xlu0 %407 }
  0xf0   :  { %4653 = vst [vmem:[#allocation25_spill] sm:$0xff] %v3336_v33  ;;  %4654 = vst [vmem:[#allocation26_spill] sm:$0xff] %v3338_v34  ;;  %1293 = vperm.xlu1 %2627, %v1254_v62   ;;  %1290 = vperm.xlu0 %2626, %v1253_v19   ;;  %v1109_v33 = vsel %vm1093_vm9, 1, %v4648_v52  ;;  %v1108_v34 = vsel %vm1092_vm10, 1, %v4648_v52  ;;  %vm563_vm9 = vcmp.eq.s32.totalorder %v3152_v36, 1  ;;  %vm412_vm10 = vcmp.eq.s32.totalorder %v3122_v47, 1 }
  0xf3   :  { %v3344_v0 = vpop.permute.xlu1 %554  ;;  %v3346_v7 = vpop.permute.xlu0 %551 }
  0xf4   :  { %4655 = vst [vmem:[#allocation27_spill] sm:$0xff] %v3344_v0  ;;  %4656 = vst [vmem:[#allocation28_spill] sm:$0xff] %v3346_v7  ;;  %1150 = vperm.xlu1 %2627, %v1107_v1   ;;  %1147 = vperm.xlu0 %2626, %v1106_v3   ;;  %v1401_v0 = vsel %vm1385_vm11, 1, %v4648_v52  ;;  %v1400_v7 = vsel %vm1384_vm12, 1, %v4648_v52  ;;  %vm562_vm11 = vcmp.eq.s32.totalorder %v3154_v37, 1  ;;  %vm712_vm12 = vcmp.eq.s32.totalorder %v3184_v15, 1 }
  0xf5   :  { %v2636_v15 = vld [vmem:[%s4562_s5 + $0x24] ss:$8 sps:$4 sm:$0xff]  }
  0xf7   :  { %v3352_v62 = vpop.permute.xlu1 %560  ;;  %v3354_v19 = vpop.permute.xlu0 %557 }
  0xf8   :  { %4657 = vst [vmem:[#allocation29_spill] sm:$0xff] %v3352_v62  ;;  %4658 = vst [vmem:[#allocation30_spill] sm:$0xff] %v3354_v19  ;;  %1156 = vperm.xlu1 %2627, %v1109_v33   ;;  %1153 = vperm.xlu0 %2626, %v1108_v34  }
  0xfb   :  { %v3360_v1 = vpop.permute.xlu1 %840  ;;  %v3362_v3 = vpop.permute.xlu0 %837 }
  0xfc   :  { %4659 = vst [vmem:[#allocation31_spill] sm:$0xff] %v3360_v1  ;;  %4660 = vst [vmem:[#allocation32_spill] sm:$0xff] %v3362_v3  ;;  %1436 = vperm.xlu1 %2627, %v1401_v0   ;;  %1433 = vperm.xlu0 %2626, %v1400_v7   ;;  %v246_v0 = vsub.f32 0.0, %v2975_v22  ;;  %v245_v7 = vsub.f32 0.0, %v2970_v21 }
  0xff   :  { %v3366_v33 = vpop.permute.xlu1 %846  ;;  %v3368_v34 = vpop.permute.xlu0 %843 }
 0x100   :  { %4661 = vst [vmem:[#allocation33_spill] sm:$0xff] %v3366_v33  ;;  %4662 = vst [vmem:[#allocation34_spill] sm:$0xff] %v3368_v34  ;;  %1442 = vperm.xlu1 %2627, %v1403_v31   ;;  %1439 = vperm.xlu0 %2626, %v1402_v32   ;;  %v1255_v32 = vsel %vm1239_vm0, 1, %v4648_v52  ;;  %v1405_v34 = vsel %vm1389_vm3, 1, %v4648_v52  ;;  %v1404_v33 = vsel %vm1388_vm4, 1, %v4648_v52  ;;  %vm4628_vm0 = vcmask 261120  }
 0x103   :  { %v3372_v19 = vpop.permute.xlu1 %1114  ;;  %v3374_v62 = vpop.permute.xlu0 %1111 }
 0x104   :  { %285 = vrot.lane.b32.xlu1 %v244_v39, %s2706_s2  ;;  %283 = vrot.lane.b32.xlu0 %v243_v40, %s2706_s2  ;;  %v1258_v39 = vsel %vm1242_vm1, 1, %v4648_v52  ;;  %v1257_v40 = vsel %vm1241_vm2, 1, %v4648_v52  ;;  %v250_v52 = vsub.f32 0.0, %v3019_v46  ;;  %vm1010_vm1 = vcmp.eq.s32.totalorder %v3292_v8, 1 }
 0x105   :  { %vm444_vm2 = vcmask 523264   ;;  %vm1159_vm3 = vcmp.eq.s32.totalorder %v3372_v19, 1  ;;  %vm1158_vm4 = vcmp.eq.s32.totalorder %v3374_v62, 1 }
 0x107   :  { %v3382_v31 = vpop.permute.xlu1 %1120  ;;  %v3384_v14 = vpop.permute.xlu0 %1117 }
 0x108   :  { %289 = vrot.lane.b32.xlu1 %v246_v0, %s2706_s2  ;;  %287 = vrot.lane.b32.xlu0 %v245_v7, %s2706_s2 }
 0x10b   :  { %v3392_v21 = vpop.permute.xlu1 %1126  ;;  %v3394_v22 = vpop.permute.xlu0 %1123 }
 0x10c   :  { %1299 = vperm.xlu1 %2627, %v1256_v13   ;;  %1296 = vperm.xlu0 %2626, %v1255_v32  }
 0x10f   :  { %v3400_v0 = vpop.permute.xlu1 %1132  ;;  %v3402_v7 = vpop.permute.xlu0 %1129 }
 0x110   :  { %4663 = vst [vmem:[#allocation35_spill] sm:$0xff] %v3400_v0  ;;  %4664 = vst [vmem:[#allocation36_spill] sm:$0xff] %v3402_v7  ;;  %1305 = vperm.xlu1 %2627, %v1258_v39   ;;  %1302 = vperm.xlu0 %2626, %v1257_v40  }
 0x113   :  { %v3408_v13 = vpop.permute.xlu1 %703  ;;  %v3410_v32 = vpop.permute.xlu0 %700 }
 0x114   :  { %4665 = vst [vmem:[#allocation37_spill] sm:$0xff] %v3408_v13  ;;  %4666 = vst [vmem:[#allocation38_spill] sm:$0xff] %v3410_v32  ;;  %1448 = vperm.xlu1 %2627, %v1405_v34   ;;  %1445 = vperm.xlu0 %2626, %v1404_v33   ;;  %v249_v33 = vsub.f32 0.0, %v3014_v45 }
 0x117   :  { %v3414_v39 = vpop.permute.xlu1 %709  ;;  %v3416_v40 = vpop.permute.xlu0 %706 }
 0x118   :  { %4667 = vst [vmem:[#allocation39_spill] sm:$0xff] %v3414_v39  ;;  %4668 = vst [vmem:[#allocation40_spill] sm:$0xff] %v3416_v40  ;;  %1454 = vperm.xlu1 %2627, %v1407_v23   ;;  %1451 = vperm.xlu0 %2626, %v1406_v24  }
 0x11b   :  { %v3420_v3 = vpop.permute.xlu1 %989  ;;  %v3422_v13 = vpop.permute.xlu0 %986 }
 0x11c   :  { %4669 = vst [vmem:[#allocation41_spill] sm:$0xff] %v3420_v3  ;;  %4670 = vst [vmem:[#allocation42_spill] sm:$0xff] %v3422_v13  ;;  %291 = vrot.lane.b32.xlu0 %v247_v27, %s2706_s2  ;;  %293 = vrot.lane.b32.xlu1 %v248_v28, %s2706_s2  ;;  %v3465_v13 = vpop.f32.mrb[0].mxu0  ;;  %v3467_v3 = vpop.f32.mrb[0].mxu1 }
 0x11d   :  { %4681 = vst [vmem:[#allocation53_spill] sm:$0xff] %v3465_v13  ;;  %4682 = vst [vmem:[#allocation54_spill] sm:$0xff] %v3467_v3  ;;  %v2474_v1 = vpop.f32.mrb[1].mxu0  ;;  %v2509_v4 = vpop.f32.mrb[1].mxu1  ;;  %v2628_v3 = vld [vmem:[%s4562_s5] ss:$8 sps:$4 sm:$0xff]  }
 0x11e   :  { %v2630_v13 = vld [vmem:[%s4562_s5 + $0x4] ss:$8 sps:$4 sm:$0xff]  }
 0x11f   :  { %v3428_v34 = vpop.permute.xlu1 %995  ;;  %v3430_v23 = vpop.permute.xlu0 %992  ;;  %1661 = vmatprep.subr.bf16.mxu0 %v2630_v13 }
 0x120   :  { %4671 = vst [vmem:[#allocation43_spill] sm:$0xff] %v3428_v34  ;;  %4672 = vst [vmem:[#allocation44_spill] sm:$0xff] %v3430_v23  ;;  %295 = vrot.lane.b32.xlu0 %v249_v33, %s2706_s2  ;;  %297 = vrot.lane.b32.xlu1 %v250_v52, %s2706_s2 }
 0x121   :  { %1662 = vmatpush1.bf16.msra.mxu0 %v2628_v3 }
 0x123   :  { %v3437_v30 = vpop.permute.xlu1 %1263  ;;  %v3439_v24 = vpop.permute.xlu0 %1260 }
 0x124   :  { %228 = vperm.xlu0 %2626, %v60_v29   ;;  %vm1308_vm5 = vcmp.eq.s32.totalorder %v3437_v30, 1  ;;  %vm1307_vm8 = vcmp.eq.s32.totalorder %v3439_v24, 1 }
 0x127   :  { %v3441_v45 = vpop.permute.xlu1 %1269  ;;  %v3443_v46 = vpop.permute.xlu0 %1266 }
 0x12b   :  { %v3445_v27 = vpop.permute.xlu1 %1275  ;;  %v3447_v28 = vpop.permute.xlu0 %1272 }
 0x12f   :  { %v3449_v33 = vpop.permute.xlu1 %1281  ;;  %v3451_v52 = vpop.permute.xlu0 %1278 }
 0x130   :  { %4673 = vst [vmem:[#allocation45_spill] sm:$0xff] %v3449_v33  ;;  %4674 = vst [vmem:[#allocation46_spill] sm:$0xff] %v3451_v52 }
 0x133   :  { %v3453_v40 = vpop.permute.xlu1 %852  ;;  %v3455_v39 = vpop.permute.xlu0 %849 }
 0x134   :  { %4675 = vst [vmem:[#allocation47_spill] sm:$0xff] %v3453_v40  ;;  %4676 = vst [vmem:[#allocation48_spill] sm:$0xff] %v3455_v39 }
 0x137   :  { %v3457_v32 = vpop.permute.xlu1 %858  ;;  %v3459_v23 = vpop.permute.xlu0 %855 }
 0x138   :  { %4677 = vst [vmem:[#allocation49_spill] sm:$0xff] %v3457_v32  ;;  %4678 = vst [vmem:[#allocation50_spill] sm:$0xff] %v3459_v23 }
 0x13b   :  { %v3461_v29 = vpop.permute.xlu1 %1138  ;;  %v3463_v34 = vpop.permute.xlu0 %1135 }
 0x13c   :  { %4679 = vst [vmem:[#allocation51_spill] sm:$0xff] %v3461_v29  ;;  %4680 = vst [vmem:[#allocation52_spill] sm:$0xff] %v3463_v34 }
 0x13f   :  { %v3469_v7 = vpop.permute.xlu1 %1144  ;;  %v3471_v52 = vpop.permute.xlu0 %1141 }
 0x140   :  { %4683 = vst [vmem:[#allocation55_spill] sm:$0xff] %v3469_v7  ;;  %4684 = vst [vmem:[#allocation56_spill] sm:$0xff] %v3471_v52 }
 0x143   :  { %v1413_v40 = vpop.permute.xlu1 %1412  ;;  %v3473_v39 = vpop.permute.xlu0 %1409 }
 0x144   :  { %vm1457_vm15 = vcmp.eq.s32.totalorder %v1413_v40, 1  ;;  %vm1456_vm13 = vcmp.eq.s32.totalorder %v3473_v39, 1 }
 0x147   :  { %v3475_v32 = vpop.permute.xlu1 %1418  ;;  %v3477_v23 = vpop.permute.xlu0 %1415 }
 0x14b   :  { %v3479_v29 = vpop.permute.xlu1 %1424  ;;  %v3481_v34 = vpop.permute.xlu0 %1421 }
 0x14f   :  { %v3485_v4 = vpop.permute.xlu1 %1430  ;;  %v3487_v1 = vpop.permute.xlu0 %1427 }
 0x150   :  { %4685 = vst [vmem:[#allocation57_spill] sm:$0xff] %v3485_v4  ;;  %4686 = vst [vmem:[#allocation58_spill] sm:$0xff] %v3487_v1  ;;  %v2633_v1 = vld [vmem:[%s4562_s5 + $0x14] ss:$8 sps:$4 sm:$0xff]  }
 0x151   :  { %1663 = vmatprep.subr.bf16.mxu0 %v2633_v1  ;;  %v2634_v1 = vld [vmem:[%s4562_s5 + $0x20] ss:$8 sps:$4 sm:$0xff]  }
 0x152   :  { %1664 = vmatpush1.bf16.msra.mxu0 %v2631_v25 }
 0x153   :  { %v270_v52 = vpop.permute.xlu1 %269  ;;  %v268_v7 = vpop.permute.xlu0 %267  ;;  %1665 = vmatprep.subr.bf16.mxu0 %v2636_v15 }
 0x154   :  { %v317_v63 = vsel %vm4628_vm0, %v2685_v44, %v270_v52  ;;  %v316_v36 = vsel %vm4628_vm0, %v2686_v9, %v268_v7 }
 0x155   :  { %v429_v4 = vsel %vm413_vm7, %v317_v63, -inf  ;;  %v579_v33 = vsel %vm563_vm9, %v317_v63, -inf  ;;  %v728_v0 = vsel %vm712_vm12, %v317_v63, -inf  ;;  %v877_v43 = vsel %vm861_vm14, %v317_v63, -inf }
 0x156   :  { %v3527_v44 = vsel %vm444_vm2, %v429_v4, -inf  ;;  %v3530_v13 = vsel %vm444_vm2, %v579_v33, -inf  ;;  %vm415_vm7 = vcmp.eq.s32.totalorder %v3128_v6, 1  ;;  %vm565_vm9 = vcmp.eq.s32.totalorder %v3160_v42, 1  ;;  %1666 = vmatpush1.bf16.msra.mxu0 %v2634_v1 }
 0x157   :  { %v3542_v41 = vsel %vm444_vm2, %v728_v0, -inf  ;;  %v1175_v3 = vsel %vm1159_vm3, %v317_v63, -inf  ;;  %v1324_v33 = vsel %vm1308_vm5, %v317_v63, -inf  ;;  %v1473_v7 = vsel %vm1457_vm15, %v317_v63, -inf  ;;  %v274_v52 = vpop.permute.xlu1 %273  ;;  %v272_v4 = vpop.permute.xlu0 %271 }
 0x158   :  { %vm714_vm12 = vcmp.eq.s32.totalorder %v3192_v35, 1  ;;  %v3555_v0 = vsel %vm444_vm2, %v877_v43, -inf  ;;  %v1026_v19 = vsel %vm1010_vm1, %v317_v63, -inf  ;;  %v3560_v30 = vsel %vm444_vm2, %v1175_v3, -inf }
 0x159   :  { %v3563_v40 = vsel %vm444_vm2, %v1324_v33, -inf  ;;  %v428_v9 = vsel %vm412_vm10, %v316_v36, -inf  ;;  %v578_v2 = vsel %vm562_vm11, %v316_v36, -inf  ;;  %vm4687_vm15 = vcmp.eq.s32.totalorder %v3186_v18, 1 }
 0x15a   :  { %v727_v10 = vsel %vm4687_vm15, %v316_v36, -inf  ;;  %vm4688_vm3 = vcmp.eq.s32.totalorder %v3250_v49, 1  ;;  %vm1161_vm1 = vcmp.eq.s32.totalorder %v3382_v31, 1  ;;  %vm1310_vm5 = vcmp.eq.s32.totalorder %v3441_v45, 1 }
 0x15b   :  { %v876_v43 = vsel %vm4688_vm3, %v316_v36, -inf  ;;  %vm1459_vm14 = vcmp.eq.s32.totalorder %v3475_v32, 1  ;;  %v3577_v63 = vsel %vm444_vm2, %v1473_v7, -inf  ;;  %v3580_v47 = vsel %vm444_vm2, %v428_v9, -inf  ;;  %v3589_v25 = vpop.permute.xlu1 %277  ;;  %v3591_v49 = vpop.permute.xlu0 %275 }
 0x15c   :  { %v3583_v37 = vsel %vm444_vm2, %v578_v2, -inf  ;;  %v3586_v18 = vsel %vm444_vm2, %v727_v10, -inf  ;;  %vm1012_vm10 = vcmp.eq.s32.totalorder %v3302_v12, 1  ;;  %v3594_v8 = vsel %vm444_vm2, %v876_v43, -inf }
 0x15d   :  { %v1174_v3 = vsel %vm1158_vm4, %v316_v36, -inf  ;;  %v1323_v2 = vsel %vm1307_vm8, %v316_v36, -inf  ;;  %v1472_v10 = vsel %vm1456_vm13, %v316_v36, -inf  ;;  %vm414_vm11 = vcmp.eq.s32.totalorder %v3120_v58, 1 }
 0x15e   :  { %vm564_vm15 = vcmp.eq.s32.totalorder %v3162_v48, 1  ;;  %v1025_v15 = vsel %vm1009_vm6, %v316_v36, -inf  ;;  %v1190_v33 = vsel %vm444_vm2, %v1174_v3, -inf  ;;  %v1339_v7 = vsel %vm444_vm2, %v1323_v2, -inf }
 0x15f   :  { %v1488_v62 = vsel %vm444_vm2, %v1472_v10, -inf  ;;  %vm713_vm4 = vcmp.eq.s32.totalorder %v3194_v38, 1  ;;  %v1197_v39 = vmax.f32 %v3560_v30, %v1190_v33  ;;  %v1346_v24 = vmax.f32 %v3563_v40, %v1339_v7  ;;  %v3618_v43 = vpop.permute.xlu1 %281  ;;  %v3620_v3 = vpop.permute.xlu0 %279  ;;  %v2690_v38 = vld [vmem:[%s4559_s0 + $0x20] sm:$0xff] }
 0x160   :  { %v1495_v9 = vmax.f32 %v3577_v63, %v1488_v62  ;;  %v319_v36 = vsel %vm4628_vm0, %v2687_v11, %v274_v52  ;;  %vm1160_vm13 = vcmp.eq.s32.totalorder %v3384_v14, 1  ;;  %vm1309_vm6 = vcmp.eq.s32.totalorder %v3443_v46, 1 }
 0x161   :  { %v3626_v1 = vsel %vm444_vm2, %v1026_v19, -inf  ;;  %v452_v30 = vmax.f32 %v3527_v44, %v3580_v47  ;;  %v431_v40 = vsel %vm415_vm7, %v319_v36, -inf  ;;  %v581_v52 = vsel %vm565_vm9, %v319_v36, -inf  ;;  %v2688_v47 = vld [vmem:[%s4559_s0 + $0x10] sm:$0xff] }
 0x162   :  { %vm1011_vm8 = vcmp.eq.s32.totalorder %v3304_v53, 1  ;;  %v3636_v63 = vsel %vm444_vm2, %v1025_v15, -inf  ;;  %v448_v2 = vsel %vm444_vm2, %v431_v40, -inf  ;;  %v730_v19 = vsel %vm714_vm12, %v319_v36, -inf }
 0x163   :  { %vm4689_vm3 = vcmp.eq.s32.totalorder %v3256_v56, 1  ;;  %v601_v6 = vmax.f32 %v3530_v13, %v3583_v37  ;;  %v750_v42 = vmax.f32 %v3542_v41, %v3586_v18  ;;  %v899_v44 = vmax.f32 %v3555_v0, %v3594_v8  ;;  %v3662_v37 = vpop.permute.xlu1 %1001  ;;  %v3664_v18 = vpop.permute.xlu0 %998 }
 0x164   :  { %v879_v10 = vsel %vm4689_vm3, %v319_v36, -inf  ;;  %v318_v15 = vsel %vm4628_vm0, %v2688_v47, %v272_v4  ;;  %vm417_vm7 = vcmp.eq.s32.totalorder %v3136_v16, 1  ;;  %vm567_vm9 = vcmp.eq.s32.totalorder %v3168_v51, 1 }
 0x165   :  { %v597_v35 = vsel %vm444_vm2, %v581_v52, -inf  ;;  %v1177_v56 = vsel %vm1161_vm1, %v319_v36, -inf  ;;  %v1326_v13 = vsel %vm1310_vm5, %v319_v36, -inf  ;;  %v1475_v41 = vsel %vm1459_vm14, %v319_v36, -inf }
 0x166   :  { %vm716_vm12 = vcmp.eq.s32.totalorder %v3200_v50, 1  ;;  %vm865_vm3 = vcmp.eq.s32.totalorder %v3264_v59, 1  ;;  %v1028_v4 = vsel %vm1012_vm10, %v319_v36, -inf  ;;  %v1193_v31 = vsel %vm444_vm2, %v1177_v56, -inf }
 0x167   :  { %v1342_v33 = vsel %vm444_vm2, %v1326_v13, -inf  ;;  %v1491_v45 = vsel %vm444_vm2, %v1475_v41, -inf  ;;  %v1048_v32 = vmax.f32 %v3626_v1, %v3636_v63  ;;  %v3675_v7 = vmax.f32 %v1193_v31, %v1197_v39  ;;  %v3699_v63 = vpop.permute.xlu1 %1007  ;;  %v3701_v58 = vpop.permute.xlu0 %1004 }
 0x168   :  { %v3677_v62 = vmax.f32 %v1342_v33, %v1346_v24  ;;  %v3679_v11 = vmax.f32 %v1491_v45, %v1495_v9  ;;  %vm1163_vm14 = vcmp.eq.s32.totalorder %v3392_v21, 1  ;;  %vm1312_vm1 = vcmp.eq.s32.totalorder %v3445_v27, 1 }
 0x169   :  { %v746_v12 = vsel %vm444_vm2, %v730_v19, -inf  ;;  %v895_v36 = vsel %vm444_vm2, %v879_v10, -inf  ;;  %v430_v40 = vsel %vm414_vm11, %v318_v15, -inf  ;;  %v580_v39 = vsel %vm564_vm15, %v318_v15, -inf  ;;  %v2689_v10 = vld [vmem:[%s4559_s0 + $0x28] sm:$0xff] }
 0x16a   :  { %vm1014_vm10 = vcmp.eq.s32.totalorder %v3312_v60, 1  ;;  %v1044_v24 = vsel %vm444_vm2, %v1028_v4, -inf  ;;  %v3693_v9 = vsel %vm444_vm2, %v430_v40, -inf  ;;  %v729_v1 = vsel %vm713_vm4, %v318_v15, -inf }
 0x16b   :  { %vm4690_vm5 = vcmp.eq.s32.totalorder %v3258_v5, 1  ;;  %v3703_v19 = vmax.f32 %v448_v2, %v452_v30  ;;  %v3705_v48 = vmax.f32 %v597_v35, %v601_v6  ;;  %v321_v47 = vsel %vm4628_vm0, %v2689_v10, %v3589_v25  ;;  %v3742_v4 = vpop.permute.xlu1 %1287  ;;  %v3744_v31 = vpop.permute.xlu0 %1284 }
 0x16c   :  { %v878_v52 = vsel %vm4690_vm5, %v318_v15, -inf  ;;  %v3717_v5 = vsel %vm4628_vm0, %v2690_v38, %v3591_v49  ;;  %vm416_vm11 = vcmp.eq.s32.totalorder %v3138_v17, 1  ;;  %v3721_v30 = vsel %vm444_vm2, %v580_v39, -inf  ;;  %v4696_v38 = vld [vmem:[#allocation35_spill] sm:$0xff] }
 0x16d   :  { %v1176_v2 = vsel %vm1160_vm13, %v318_v15, -inf  ;;  %v1325_v6 = vsel %vm1309_vm6, %v318_v15, -inf  ;;  %vm4691_vm15 = vcmp.eq.s32.totalorder %v3477_v23, 1  ;;  %vm566_vm4 = vcmp.eq.s32.totalorder %v3170_v54, 1 }
 0x16e   :  { %v1474_v25 = vsel %vm4691_vm15, %v318_v15, -inf  ;;  %vm715_vm5 = vcmp.eq.s32.totalorder %v3202_v55, 1  ;;  %vm864_vm0 = vcmp.eq.s32.totalorder %v3266_v26, 1  ;;  %v1027_v49 = vsel %vm1011_vm8, %v318_v15, -inf }
 0x16f   :  { %v1192_v35 = vsel %vm444_vm2, %v1176_v2, -inf  ;;  %v1341_v14 = vsel %vm444_vm2, %v1325_v6, -inf  ;;  %v1490_v56 = vsel %vm444_vm2, %v1474_v25, -inf  ;;  %v3737_v46 = vmax.f32 %v746_v12, %v750_v42  ;;  %v3782_v8 = vpop.permute.xlu1 %1293  ;;  %v4698_v2 = vld [vmem:[#allocation57_spill] sm:$0xff] }
 0x170   :  { %v1201_v23 = vmax.f32 %v1192_v35, %v3675_v7  ;;  %v1350_v13 = vmax.f32 %v1341_v14, %v3677_v62  ;;  %v1499_v41 = vmax.f32 %v1490_v56, %v3679_v11  ;;  %vm1162_vm8 = vcmp.eq.s32.totalorder %v3394_v22, 1 }
 0x171   :  { %vm1311_vm13 = vcmp.eq.s32.totalorder %v3447_v28, 1  ;;  %vm1460_vm6 = vcmp.eq.s32.totalorder %v3481_v34, 1  ;;  %v3750_v53 = vsel %vm444_vm2, %v729_v1, -inf  ;;  %v3753_v42 = vsel %vm444_vm2, %v878_v52, -inf }
 0x172   :  { %v433_v15 = vsel %vm417_vm7, %v321_v47, -inf  ;;  %v583_v33 = vsel %vm567_vm9, %v321_v47, -inf  ;;  %vm1013_vm15 = vcmp.eq.s32.totalorder %v3314_v61, 1  ;;  %v1043_v45 = vsel %vm444_vm2, %v1027_v49, -inf  ;;  %v4700_v61 = vld [vmem:[#allocation4_spill] sm:$0xff] }
 0x173   :  { %v451_v7 = vsel %vm444_vm2, %v433_v15, -inf  ;;  %v732_v62 = vsel %vm716_vm12, %v321_v47, -inf  ;;  %v881_v11 = vsel %vm865_vm3, %v321_v47, -inf  ;;  %v3769_v16 = vmax.f32 %v895_v36, %v899_v44  ;;  %v3784_v44 = vpop.permute.xlu0 %1290  ;;  %v3820_v35 = vpop.permute.xlu1 %1150 }
 0x174   :  { %v1046_v12 = vmax.f32 %v1044_v24, %v1048_v32  ;;  %v456_v51 = vmax.f32 %v3693_v9, %v3703_v19  ;;  %v605_v40 = vmax.f32 %v3721_v30, %v3705_v48  ;;  %v600_v39 = vsel %vm444_vm2, %v583_v33, -inf  ;;  %v4693_v24 = vld [vmem:[#allocation5_spill] sm:$0xff] }
 0x175   :  { %v1179_v50 = vsel %vm1163_vm14, %v321_v47, -inf  ;;  %v1328_v59 = vsel %vm1312_vm1, %v321_v47, -inf  ;;  %vm4692_vm7 = vcmp.eq.s32.totalorder %v3479_v29, 1  ;;  %vm419_vm9 = vcmp.eq.s32.totalorder %v3144_v20, 1  ;;  %v4694_v29 = vld [vmem:[#allocation15_spill] sm:$0xff]  ;;  %v4697_v30 = vld [vmem:[#allocation45_spill] sm:$0xff] }
 0x176   :  { %v1477_v0 = vsel %vm4692_vm7, %v321_v47, -inf  ;;  %vm569_vm12 = vcmp.eq.s32.totalorder %v3176_v57, 1  ;;  %v1030_v32 = vsel %vm1014_vm10, %v321_v47, -inf  ;;  %v1196_v21 = vsel %vm444_vm2, %v1179_v50, -inf  ;;  %v4695_v47 = vld [vmem:[#allocation21_spill] sm:$0xff]  ;;  %v4703_v50 = vld [vmem:[#allocation22_spill] sm:$0xff] }
 0x177   :  { %v1345_v36 = vsel %vm444_vm2, %v1328_v59, -inf  ;;  %v1494_v27 = vsel %vm444_vm2, %v1477_v0, -inf  ;;  %vm718_vm3 = vcmp.eq.s32.totalorder %v4693_v24, 1  ;;  %v3795_v9 = vmax.f32 %v1196_v21, %v1201_v23  ;;  %v3822_v14 = vpop.permute.xlu0 %1147  ;;  %v4704_v59 = vld [vmem:[#allocation36_spill] sm:$0xff] }
 0x178   :  { %v3797_v1 = vmax.f32 %v1345_v36, %v1350_v13  ;;  %v3799_v52 = vmax.f32 %v1494_v27, %v1499_v41  ;;  %v1052_v19 = vmax.f32 %v1043_v45, %v1046_v12  ;;  %v749_v60 = vsel %vm444_vm2, %v732_v62, -inf  ;;  %v3849_v62 = vpop.permute.xlu1 %1156  ;;  %v4706_v57 = vld [vmem:[#allocation16_spill] sm:$0xff] }
 0x179   :  { %v898_v48 = vsel %vm444_vm2, %v881_v11, -inf  ;;  %v432_v10 = vsel %vm416_vm11, %v3717_v5, -inf  ;;  %vm1016_vm1 = vcmp.eq.s32.totalorder %v4695_v47, 1  ;;  %vm1165_vm10 = vcmp.eq.s32.totalorder %v4696_v38, 1  ;;  %v4699_v11 = vld [vmem:[#allocation3_spill] sm:$0xff] }
 0x17a   :  { %vm1314_vm7 = vcmp.eq.s32.totalorder %v4697_v30, 1  ;;  %vm1463_vm14 = vcmp.eq.s32.totalorder %v4698_v2, 1  ;;  %v1047_v6 = vsel %vm444_vm2, %v1030_v32, -inf  ;;  %v582_v25 = vsel %vm566_vm4, %v3717_v5, -inf  ;;  %v2692_v30 = vld [vmem:[%s4559_s0 + $0x30] sm:$0xff] }
 0x17b   :  { %v731_v49 = vsel %vm715_vm5, %v3717_v5, -inf  ;;  %v880_v17 = vsel %vm864_vm0, %v3717_v5, -inf  ;;  %v754_v56 = vmax.f32 %v3750_v53, %v3737_v46  ;;  %v903_v23 = vmax.f32 %v3753_v42, %v3769_v16  ;;  %v3851_v34 = vpop.permute.xlu0 %1153 }
 0x17c   :  { %v454_v54 = vmax.f32 %v451_v7, %v456_v51  ;;  %v3828_v13 = vmax.f32 %v600_v39, %v605_v40  ;;  %v449_v55 = vsel %vm444_vm2, %v432_v10, -inf  ;;  %v1178_v26 = vsel %vm1162_vm8, %v3717_v5, -inf  ;;  %v2691_v40 = vld [vmem:[%s4559_s0 + $0x38] sm:$0xff]  ;;  %v3882_v20 = vpop.permute.xlu1 %1436 }
 0x17d   :  { %v1327_v41 = vsel %vm1311_vm13, %v3717_v5, -inf  ;;  %v1476_v46 = vsel %vm1460_vm6, %v3717_v5, -inf  ;;  %v1029_v53 = vsel %vm1013_vm15, %v3717_v5, -inf  ;;  %v1194_v42 = vsel %vm444_vm2, %v1178_v26, -inf  ;;  %v4701_v5 = vld [vmem:[#allocation6_spill] sm:$0xff] }
 0x17e   :  { %v1343_v15 = vsel %vm444_vm2, %v1327_v41, -inf  ;;  %v1492_v33 = vsel %vm444_vm2, %v1476_v46, -inf  ;;  %v1050_v22 = vmax.f32 %v1047_v6, %v1052_v19  ;;  %v1205_v45 = vmax.f32 %v1194_v42, %v3795_v9  ;;  %v4710_v42 = vld [vmem:[#allocation7_spill] sm:$0xff] }
 0x17f   :  { %v1354_v28 = vmax.f32 %v1343_v15, %v3797_v1  ;;  %v1503_v7 = vmax.f32 %v1492_v33, %v3799_v52  ;;  %vm418_vm0 = vcmp.eq.s32.totalorder %v4699_v11, 1  ;;  %vm568_vm11 = vcmp.eq.s32.totalorder %v4700_v61, 1  ;;  %v3884_v6 = vpop.permute.xlu0 %1433 }
 0x180   :  { %vm717_vm4 = vcmp.eq.s32.totalorder %v4701_v5, 1  ;;  %v3856_v16 = vmax.f32 %v749_v60, %v754_v56  ;;  %v598_v12 = vsel %vm444_vm2, %v582_v25, -inf  ;;  %v3860_v51 = vsel %vm444_vm2, %v731_v49, -inf  ;;  %v3914_v46 = vpop.permute.xlu1 %1442 }
 0x181   :  { %vm4702_vm5 = vcmask 261120   ;;  %vm1015_vm8 = vcmp.eq.s32.totalorder %v4703_v50, 1  ;;  %vm1164_vm13 = vcmp.eq.s32.totalorder %v4704_v59, 1  ;;  %v896_v0 = vsel %vm444_vm2, %v880_v17, -inf }
 0x182   :  { %v323_v39 = vsel %vm4702_vm5, %v2691_v40, %v3618_v43  ;;  %v1045_v32 = vsel %vm444_vm2, %v1029_v53, -inf  ;;  %vm4705_vm6 = vcmp.eq.s32.totalorder %v4694_v29, 1  ;;  %v901_v52 = vmax.f32 %v898_v48, %v903_v23 }
 0x183   :  { %v435_v21 = vsel %vm419_vm9, %v323_v39, -inf  ;;  %v585_v36 = vsel %vm569_vm12, %v323_v39, -inf  ;;  %v734_v43 = vsel %vm718_vm3, %v323_v39, -inf  ;;  %v883_v1 = vsel %vm4705_vm6, %v323_v39, -inf  ;;  %vm4707_vm9 = vmmov %vm4702_vm5  ;;  %v3916_v53 = vpop.permute.xlu0 %1439 }
 0x184   :  { %v455_v27 = vsel %vm444_vm2, %v435_v21, -inf  ;;  %v604_v9 = vsel %vm444_vm2, %v585_v36, -inf  ;;  %v460_v19 = vmax.f32 %v449_v55, %v454_v54  ;;  %v609_v60 = vmax.f32 %v598_v12, %v3828_v13  ;;  %v4708_v13 = vld [vmem:[#allocation46_spill] sm:$0xff]  ;;  %v286_v59 = vpop.permute.xlu1 %285  ;;  %vm4720_vm6 = vmmov %vm4707_vm9 }
 0x185   :  { %v1056_v10 = vmax.f32 %v1045_v32, %v1050_v22  ;;  %vm866_vm15 = vcmp.eq.s32.totalorder %v4706_v57, 1  ;;  %v1032_v25 = vsel %vm1016_vm1, %v323_v39, -inf  ;;  %v1181_v24 = vsel %vm1165_vm10, %v323_v39, -inf  ;;  %v4709_v55 = vld [vmem:[#allocation58_spill] sm:$0xff] }
 0x186   :  { %v1330_v29 = vsel %vm1314_vm7, %v323_v39, -inf  ;;  %v1479_v48 = vsel %vm1463_vm14, %v323_v39, -inf  ;;  %v1051_v49 = vsel %vm444_vm2, %v1032_v25, -inf  ;;  %v1200_v17 = vsel %vm444_vm2, %v1181_v24, -inf  ;;  %v4715_v25 = vld [vmem:[#allocation32_spill] sm:$0xff]  ;;  %v4716_v24 = vld [vmem:[#allocation41_spill] sm:$0xff] }
 0x187   :  { %v1349_v56 = vsel %vm444_vm2, %v1330_v29, -inf  ;;  %v1498_v23 = vsel %vm444_vm2, %v1479_v48, -inf  ;;  %v3899_v54 = vmax.f32 %v1200_v17, %v1205_v45  ;;  %v322_v2 = vsel %vm4707_vm9, %v2692_v30, %v3620_v3  ;;  %v4717_v29 = vld [vmem:[#allocation12_spill] sm:$0xff]  ;;  %v4718_v48 = vld [vmem:[#allocation51_spill] sm:$0xff] }
 0x188   :  { %v3901_v47 = vmax.f32 %v1349_v56, %v1354_v28  ;;  %v3903_v38 = vmax.f32 %v1498_v23, %v1503_v7  ;;  %vm1313_vm12 = vcmp.eq.s32.totalorder %v4708_v13, 1  ;;  %vm1462_vm3 = vcmp.eq.s32.totalorder %v4709_v55, 1  ;;  %v3976_v56 = vpop.permute.xlu1 %289  ;;  %v2693_v55 = vld [vmem:[%s4559_s0 + $0x48] sm:$0xff] }
 0x189   :  { %v758_v26 = vmax.f32 %v3860_v51, %v3856_v16  ;;  %v907_v41 = vmax.f32 %v896_v0, %v901_v52  ;;  %vm421_vm14 = vcmp.eq.s32.totalorder %v4710_v42, 1  ;;  %v3919_v15 = vmax.f32 %v455_v27, %v460_v19  ;;  %v284_v0 = vpop.permute.xlu0 %283  ;;  %v4712_v19 = vld [vmem:[#allocation8_spill] sm:$0xff] }
 0x18a   :  { %v753_v33 = vsel %vm444_vm2, %v734_v43, -inf  ;;  %v902_v3 = vsel %vm444_vm2, %v883_v1, -inf  ;;  %v3923_v22 = vmax.f32 %v1051_v49, %v1056_v10  ;;  %v3925_v45 = vmax.f32 %v604_v9, %v609_v60  ;;  %v4711_v9 = vld [vmem:[#allocation11_spill] sm:$0xff]  ;;  %v4713_v60 = vld [vmem:[#allocation17_spill] sm:$0xff] }
 0x18b   :  { %v434_v28 = vsel %vm418_vm0, %v322_v2, -inf  ;;  %v584_v7 = vsel %vm568_vm11, %v322_v2, -inf  ;;  %v733_v16 = vsel %vm717_vm4, %v322_v2, -inf  ;;  %v1031_v12 = vsel %vm1015_vm8, %v322_v2, -inf  ;;  %v4714_v10 = vld [vmem:[#allocation31_spill] sm:$0xff] }
 0x18c   :  { %v1180_v51 = vsel %vm1164_vm13, %v322_v2, -inf  ;;  %v1329_v40 = vsel %vm1313_vm12, %v322_v2, -inf  ;;  %v1478_v39 = vsel %vm1462_vm3, %v322_v2, -inf  ;;  %v3942_v11 = vsel %vm444_vm2, %v1031_v12, -inf  ;;  %v2694_v12 = vld [vmem:[%s4559_s0 + $0x40] sm:$0xff] }
 0x18d   :  { %v3945_v61 = vsel %vm444_vm2, %v1180_v51, -inf  ;;  %v3948_v5 = vsel %vm444_vm2, %v1329_v40, -inf  ;;  %v3951_v50 = vsel %vm444_vm2, %v1478_v39, -inf  ;;  %v1060_v32 = vmax.f32 %v3942_v11, %v3923_v22  ;;  %v3978_v23 = vpop.permute.xlu0 %287  ;;  %v4008_v51 = vpop.permute.xlu1 %1299 }
 0x18e   :  { %v1209_v21 = vmax.f32 %v3945_v61, %v3899_v54  ;;  %v1358_v36 = vmax.f32 %v3948_v5, %v3901_v47  ;;  %v1507_v27 = vmax.f32 %v3951_v50, %v3903_v38  ;;  %vm571_vm1 = vcmp.eq.s32.totalorder %v4711_v9, 1  ;;  %v4719_v54 = vld [vmem:[#allocation18_spill] sm:$0xff]  ;;  %v4725_v9 = vld [vmem:[#allocation13_spill] sm:$0xff] }
 0x18f   :  { %v3962_v43 = vmax.f32 %v753_v33, %v758_v26  ;;  %v905_v1 = vmax.f32 %v902_v3, %v907_v41  ;;  %v882_v52 = vsel %vm866_vm15, %v322_v2, -inf  ;;  %vm420_vm10 = vcmp.eq.s32.totalorder %v4712_v19, 1  ;;  %v4721_v41 = vld [vmem:[#allocation42_spill] sm:$0xff]  ;;  %v4722_v33 = vld [vmem:[#allocation52_spill] sm:$0xff] }
 0x190   :  { %vm720_vm7 = vcmp.eq.s32.totalorder %v4713_v60, 1  ;;  %vm869_vm0 = vcmp.eq.s32.totalorder %v4714_v10, 1  ;;  %vm868_vm11 = vcmp.eq.s32.totalorder %v4715_v25, 1  ;;  %vm1018_vm4 = vcmp.eq.s32.totalorder %v4716_v24, 1  ;;  %v4727_v10 = vld [vmem:[#allocation19_spill] sm:$0xff]  ;;  %v4730_v5 = vld [vmem:[#allocation10_spill] sm:$0xff] }
 0x191   :  { %vm570_vm5 = vcmp.eq.s32.totalorder %v4717_v29, 1  ;;  %vm1167_vm8 = vcmp.eq.s32.totalorder %v4718_v48, 1  ;;  %v453_v49 = vsel %vm444_vm2, %v434_v28, -inf  ;;  %v602_v17 = vsel %vm444_vm2, %v584_v7, -inf  ;;  %v4010_v40 = vpop.permute.xlu0 %1296 }
 0x192   :  { %v751_v57 = vsel %vm444_vm2, %v733_v16, -inf  ;;  %vm719_vm13 = vcmp.eq.s32.totalorder %v4719_v54, 1  ;;  %v464_v30 = vmax.f32 %v453_v49, %v3919_v15  ;;  %v613_v2 = vmax.f32 %v602_v17, %v3925_v45 }
 0x193   :  { %v900_v13 = vsel %vm444_vm2, %v882_v52, -inf  ;;  %v325_v26 = vsel %vm4720_vm6, %v2693_v55, %v286_v59  ;;  %vm1017_vm15 = vcmp.eq.s32.totalorder %v4721_v41, 1  ;;  %vm1166_vm9 = vcmp.eq.s32.totalorder %v4722_v33, 1  ;;  %v4724_v59 = vld [vmem:[#allocation9_spill] sm:$0xff]  ;;  %v4733_v41 = vld [vmem:[#allocation20_spill] sm:$0xff] }
 0x194   :  { %v762_v3 = vmax.f32 %v751_v57, %v3962_v43  ;;  %v911_v22 = vmax.f32 %v900_v13, %v905_v1  ;;  %v437_v15 = vsel %vm421_vm14, %v325_v26, -inf  ;;  %v885_v45 = vsel %vm869_vm0, %v325_v26, -inf  ;;  %v4726_v43 = vld [vmem:[#allocation33_spill] sm:$0xff] }
 0x195   :  { %vm1316_vm12 = vcmp.eq.s32.totalorder %v3742_v4, 1  ;;  %vm1315_vm3 = vcmp.eq.s32.totalorder %v3744_v31, 1  ;;  %v587_v28 = vsel %vm571_vm1, %v325_v26, -inf  ;;  %v906_v7 = vsel %vm444_vm2, %v885_v45, -inf }
 0x196   :  { %vm1465_vm6 = vcmp.eq.s32.totalorder %v3882_v20, 1  ;;  %v459_v16 = vsel %vm444_vm2, %v437_v15, -inf  ;;  %v736_v42 = vsel %vm720_vm7, %v325_v26, -inf  ;;  %vm4723_vm14 = vcmask 261120  }
 0x197   :  { %v324_v4 = vsel %vm4723_vm14, %v2694_v12, %v284_v0  ;;  %v1034_v39 = vsel %vm1018_vm4, %v325_v26, -inf  ;;  %v1183_v20 = vsel %vm1167_vm8, %v325_v26, -inf  ;;  %v1332_v11 = vsel %vm1316_vm12, %v325_v26, -inf }
 0x198   :  { %v1481_v61 = vsel %vm1465_vm6, %v325_v26, -inf  ;;  %vm423_vm1 = vcmp.eq.s32.totalorder %v4724_v59, 1  ;;  %vm573_vm7 = vcmp.eq.s32.totalorder %v4725_v9, 1  ;;  %vm871_vm0 = vcmp.eq.s32.totalorder %v4726_v43, 1  ;;  %v4037_v26 = vpop.permute.xlu1 %1305  ;;  %v2696_v9 = vld [vmem:[%s4559_s0 + $0x50] sm:$0xff] }
 0x199   :  { %v608_v0 = vsel %vm444_vm2, %v587_v28, -inf  ;;  %v4020_v1 = vmax.f32 %v906_v7, %v911_v22  ;;  %v1055_v52 = vsel %vm444_vm2, %v1034_v39, -inf  ;;  %v1204_v60 = vsel %vm444_vm2, %v1183_v20, -inf  ;;  %v4039_v22 = vpop.permute.xlu0 %1302 }
 0x19a   :  { %v757_v24 = vsel %vm444_vm2, %v736_v42, -inf  ;;  %v4026_v48 = vmax.f32 %v1055_v52, %v1060_v32  ;;  %v4028_v49 = vmax.f32 %v1204_v60, %v1209_v21  ;;  %v1353_v17 = vsel %vm444_vm2, %v1332_v11, -inf  ;;  %v4728_v32 = vld [vmem:[#allocation43_spill] sm:$0xff]  ;;  %v2695_v52 = vld [vmem:[%s4559_s0 + $0x58] sm:$0xff] }
 0x19b   :  { %vm1464_vm8 = vcmp.eq.s32.totalorder %v3884_v6, 1  ;;  %v1502_v57 = vsel %vm444_vm2, %v1481_v61, -inf  ;;  %v436_v13 = vsel %vm420_vm10, %v324_v4, -inf  ;;  %v884_v55 = vsel %vm868_vm11, %v324_v4, -inf  ;;  %v4729_v21 = vld [vmem:[#allocation55_spill] sm:$0xff]  ;;  %v4736_v6 = vld [vmem:[#allocation56_spill] sm:$0xff] }
 0x19c   :  { %vm1020_vm12 = vcmp.eq.s32.totalorder %v4728_v32, 1  ;;  %vm1169_vm6 = vcmp.eq.s32.totalorder %v4729_v21, 1  ;;  %vm1318_vm14 = vcmp.eq.s32.totalorder %v3782_v8, 1  ;;  %vm1467_vm4 = vcmp.eq.s32.totalorder %v3914_v46, 1  ;;  %v4086_v11 = vpop.permute.xlu1 %1448  ;;  %v4739_v21 = vld [vmem:[#allocation23_spill] sm:$0xff]  ;;  %v4741_v8 = vld [vmem:[#allocation37_spill] sm:$0xff] }
 0x19d   :  { %v4045_v15 = vmax.f32 %v459_v16, %v464_v30  ;;  %v4047_v45 = vmax.f32 %v608_v0, %v613_v2  ;;  %v586_v19 = vsel %vm570_vm5, %v324_v4, -inf  ;;  %v904_v25 = vsel %vm444_vm2, %v884_v55, -inf  ;;  %v4088_v61 = vpop.permute.xlu0 %1445  ;;  %v4742_v46 = vld [vmem:[#allocation47_spill] sm:$0xff] }
 0x19e   :  { %v4052_v28 = vmax.f32 %v757_v24, %v762_v3  ;;  %v4057_v7 = vmax.f32 %v1353_v17, %v1358_v36  ;;  %v735_v42 = vsel %vm719_vm13, %v324_v4, -inf  ;;  %v915_v30 = vmax.f32 %v904_v25, %v4020_v1  ;;  %v4731_v36 = vld [vmem:[#allocation34_spill] sm:$0xff]  ;;  %v4735_v24 = vld [vmem:[#allocation44_spill] sm:$0xff] }
 0x19f   :  { %v4065_v2 = vmax.f32 %v1502_v57, %v1507_v27  ;;  %v457_v29 = vsel %vm444_vm2, %v436_v13, -inf  ;;  %v1033_v3 = vsel %vm1017_vm15, %v324_v4, -inf  ;;  %v1182_v47 = vsel %vm1166_vm9, %v324_v4, -inf  ;;  %v4732_v27 = vld [vmem:[#allocation14_spill] sm:$0xff] }
 0x1a0   :  { %vm422_vm10 = vcmp.eq.s32.totalorder %v4730_v5, 1  ;;  %vm870_vm11 = vcmp.eq.s32.totalorder %v4731_v36, 1  ;;  %v606_v54 = vsel %vm444_vm2, %v586_v19, -inf  ;;  %v1053_v16 = vsel %vm444_vm2, %v1033_v3, -inf  ;;  %v4740_v3 = vld [vmem:[#allocation27_spill] sm:$0xff] }
 0x1a1   :  { %v1202_v38 = vsel %vm444_vm2, %v1182_v47, -inf  ;;  %v1331_v50 = vsel %vm1315_vm3, %v324_v4, -inf  ;;  %vm572_vm5 = vcmp.eq.s32.totalorder %v4732_v27, 1  ;;  %v755_v33 = vsel %vm444_vm2, %v735_v42, -inf  ;;  %v4137_v32 = vpop.permute.xlu0 %1451 }
 0x1a2   :  { %v1064_v12 = vmax.f32 %v1053_v16, %v4026_v48  ;;  %v1213_v39 = vmax.f32 %v1202_v38, %v4028_v49  ;;  %v1480_v20 = vsel %vm1464_vm8, %v324_v4, -inf  ;;  %v468_v31 = vmax.f32 %v457_v29, %v4045_v15  ;;  %v4135_v29 = vpop.permute.xlu1 %1454 }
 0x1a3   :  { %v617_v0 = vmax.f32 %v606_v54, %v4047_v45  ;;  %v766_v1 = vmax.f32 %v755_v33, %v4052_v28  ;;  %vm4734_vm15 = vcmask 261120   ;;  %vm1019_vm9 = vcmp.eq.s32.totalorder %v4735_v24, 1 }
 0x1a4   :  { %v327_v60 = vsel %vm4734_vm15, %v2695_v52, %v3976_v56  ;;  %vm1168_vm3 = vcmp.eq.s32.totalorder %v4736_v6, 1  ;;  %vm1317_vm8 = vcmp.eq.s32.totalorder %v3784_v44, 1  ;;  %vm1466_vm13 = vcmp.eq.s32.totalorder %v3916_v53, 1  ;;  %v4745_v6 = vld [vmem:[#allocation28_spill] sm:$0xff] }
 0x1a5   :  { %v1351_v4 = vsel %vm444_vm2, %v1331_v50, -inf  ;;  %v439_v48 = vsel %vm423_vm1, %v327_v60, -inf  ;;  %v589_v49 = vsel %vm573_vm7, %v327_v60, -inf  ;;  %v887_v17 = vsel %vm871_vm0, %v327_v60, -inf  ;;  %v292_v24 = vpop.permute.xlu0 %291  ;;  %v4747_v44 = vld [vmem:[#allocation48_spill] sm:$0xff] }
 0x1a6   :  { %v1362_v56 = vmax.f32 %v1351_v4, %v4057_v7  ;;  %v1500_v57 = vsel %vm444_vm2, %v1480_v20, -inf  ;;  %vm4737_vm15 = vcmp.eq.s32.totalorder %v4727_v10, 1  ;;  %v910_v55 = vsel %vm444_vm2, %v887_v17, -inf }
 0x1a7   :  { %v738_v13 = vsel %vm4737_vm15, %v327_v60, -inf  ;;  %v463_v15 = vsel %vm444_vm2, %v439_v48, -inf  ;;  %v612_v59 = vsel %vm444_vm2, %v589_v49, -inf  ;;  %v4116_v45 = vmax.f32 %v910_v55, %v915_v30  ;;  %v4746_v55 = vld [vmem:[#allocation38_spill] sm:$0xff] }
 0x1a8   :  { %vm4738_vm1 = vcmask 261120   ;;  %v1036_v19 = vsel %vm1020_vm12, %v327_v60, -inf  ;;  %v1185_v10 = vsel %vm1169_vm6, %v327_v60, -inf  ;;  %v1334_v25 = vsel %vm1318_vm14, %v327_v60, -inf }
 0x1a9   :  { %v326_v43 = vsel %vm4738_vm1, %v2696_v9, %v3978_v23  ;;  %v1483_v28 = vsel %vm1467_vm4, %v327_v60, -inf  ;;  %v1509_v7 = vmax.f32 %v1500_v57, %v4065_v2  ;;  %v761_v42 = vsel %vm444_vm2, %v738_v13, -inf  ;;  %v294_v57 = vpop.permute.xlu1 %293  ;;  %v4744_v13 = vld [vmem:[#allocation24_spill] sm:$0xff] }
 0x1aa   :  { %v1059_v30 = vsel %vm444_vm2, %v1036_v19, -inf  ;;  %v1208_v23 = vsel %vm444_vm2, %v1185_v10, -inf  ;;  %vm425_vm7 = vcmp.eq.s32.totalorder %v4739_v21, 1  ;;  %vm575_vm0 = vcmp.eq.s32.totalorder %v4740_v3, 1 }
 0x1ab   :  { %vm724_vm12 = vcmp.eq.s32.totalorder %v4741_v8, 1  ;;  %vm873_vm4 = vcmp.eq.s32.totalorder %v4742_v46, 1  ;;  %v4143_v47 = vmax.f32 %v1059_v30, %v1064_v12  ;;  %v4145_v2 = vmax.f32 %v1208_v23, %v1213_v39 }
 0x1ac   :  { %v1357_v54 = vsel %vm444_vm2, %v1334_v25, -inf  ;;  %v1506_v16 = vsel %vm444_vm2, %v1483_v28, -inf  ;;  %v466_v38 = vmax.f32 %v463_v15, %v468_v31  ;;  %v615_v50 = vmax.f32 %v612_v59, %v617_v0  ;;  %v2697_v28 = vld [vmem:[%s4559_s0 + $0x68] sm:$0xff] }
 0x1ad   :  { %v438_v33 = vsel %vm422_vm10, %v326_v43, -inf  ;;  %v886_v20 = vsel %vm870_vm11, %v326_v43, -inf  ;;  %v764_v52 = vmax.f32 %v761_v42, %v766_v1  ;;  %v588_v60 = vsel %vm572_vm5, %v326_v43, -inf  ;;  %v2698_v42 = vld [vmem:[%s4559_s0 + $0x60] sm:$0xff] }
 0x1ae   :  { %vm4743_vm6 = vcmp.eq.s32.totalorder %v4733_v41, 1  ;;  %v908_v39 = vsel %vm444_vm2, %v886_v20, -inf  ;;  %vm1022_vm14 = vcmp.eq.s32.totalorder %v3662_v37, 1  ;;  %vm1171_vm15 = vcmp.eq.s32.totalorder %v3820_v35, 1 }
 0x1af   :  { %v737_v12 = vsel %vm4743_vm6, %v326_v43, -inf  ;;  %v4160_v31 = vmax.f32 %v1357_v54, %v1362_v56  ;;  %v4162_v5 = vmax.f32 %v1506_v16, %v1509_v7  ;;  %v461_v36 = vsel %vm444_vm2, %v438_v33, -inf }
 0x1b0   :  { %v920_v0 = vmax.f32 %v4116_v45, %v908_v39  ;;  %vm1320_vm10 = vcmp.eq.s32.totalorder %v4008_v51, 1  ;;  %v1035_v27 = vsel %vm1019_vm9, %v326_v43, -inf  ;;  %v1184_v41 = vsel %vm1168_vm3, %v326_v43, -inf  ;;  %v296_v39 = vpop.permute.xlu0 %295 }
 0x1b1   :  { %v1333_v1 = vsel %vm1317_vm8, %v326_v43, -inf  ;;  %v1482_v4 = vsel %vm1466_vm13, %v326_v43, -inf  ;;  %v610_v48 = vsel %vm444_vm2, %v588_v60, -inf  ;;  %v759_v49 = vsel %vm444_vm2, %v737_v12, -inf  ;;  %vm4748_vm8 = vmmov %vm4738_vm1 }
 0x1b2   :  { %v1057_v17 = vsel %vm444_vm2, %v1035_v27, -inf  ;;  %v1206_v56 = vsel %vm444_vm2, %v1184_v41, -inf  ;;  %vm424_vm11 = vcmp.eq.s32.totalorder %v4744_v13, 1  ;;  %v473_v53 = vmax.f32 %v466_v38, %v461_v36  ;;  %v4751_v36 = vld [vmem:[#allocation39_spill] sm:$0xff] }
 0x1b3   :  { %v1069_v15 = vmax.f32 %v4143_v47, %v1057_v17  ;;  %v1217_v59 = vmax.f32 %v1206_v56, %v4145_v2  ;;  %v1355_v45 = vsel %vm444_vm2, %v1333_v1, -inf  ;;  %v622_v9 = vmax.f32 %v615_v50, %v610_v48 }
 0x1b4   :  { %v771_v43 = vmax.f32 %v764_v52, %v759_v49  ;;  %v1366_v19 = vmax.f32 %v1355_v45, %v4160_v31  ;;  %v1504_v10 = vsel %vm444_vm2, %v1482_v4, -inf  ;;  %vm1469_vm13 = vcmp.eq.s32.totalorder %v4086_v11, 1  ;;  %v4749_v31 = vld [vmem:[#allocation25_spill] sm:$0xff] }
 0x1b5   :  { %v1513_v25 = vmax.f32 %v1504_v10, %v4162_v5  ;;  %v329_v7 = vsel %vm4748_vm8, %v2697_v28, %v294_v57  ;;  %v328_v30 = vsel %vm4738_vm1, %v2698_v42, %v292_v24  ;;  %vm1021_vm6 = vcmp.eq.s32.totalorder %v3664_v18, 1  ;;  %v4750_v5 = vld [vmem:[#allocation29_spill] sm:$0xff]  ;;  %v229_v10 = vpop.permute.xlu0 %228  ;;  %v4757_v28 = vld [vmem:[#allocation30_spill] sm:$0xff] }
 0x1b6   :  { %vm1170_vm3 = vcmp.eq.s32.totalorder %v3822_v14, 1  ;;  %vm1319_vm9 = vcmp.eq.s32.totalorder %v4010_v40, 1  ;;  %vm1468_vm5 = vcmp.eq.s32.totalorder %v4088_v61, 1  ;;  %v441_v23 = vsel %vm425_vm7, %v329_v7, -inf  ;;  %v4759_v42 = vld [vmem:[#allocation50_spill] sm:$0xff] }
 0x1b7   :  { %v591_v47 = vsel %vm575_vm0, %v329_v7, -inf  ;;  %v740_v2 = vsel %vm724_vm12, %v329_v7, -inf  ;;  %v889_v54 = vsel %vm873_vm4, %v329_v7, -inf  ;;  %v467_v16 = vsel %vm444_vm2, %v441_v23, -inf }
 0x1b8   :  { %v616_v38 = vsel %vm444_vm2, %v591_v47, -inf  ;;  %v765_v50 = vsel %vm444_vm2, %v740_v2, -inf  ;;  %v914_v33 = vsel %vm444_vm2, %v889_v54, -inf  ;;  %v4214_v20 = vmax.f32 %v467_v16, %v473_v53  ;;  %v2699_v54 = vld [vmem:[%s4559_s0 + $0x78] sm:$0xff] }
 0x1b9   :  { %v4216_v21 = vmax.f32 %v616_v38, %v622_v9  ;;  %v4218_v3 = vmax.f32 %v765_v50, %v771_v43  ;;  %v4220_v52 = vmax.f32 %v914_v33, %v920_v0  ;;  %v1038_v8 = vsel %vm1022_vm14, %v329_v7, -inf  ;;  %v4752_v0 = vld [vmem:[#allocation49_spill] sm:$0xff]  ;;  %v2700_v38 = vld [vmem:[%s4559_s0 + $0x70] sm:$0xff] }
 0x1ba   :  { %v1187_v46 = vsel %vm1171_vm15, %v329_v7, -inf  ;;  %v1336_v60 = vsel %vm1320_vm10, %v329_v7, -inf  ;;  %v1485_v12 = vsel %vm1469_vm13, %v329_v7, -inf  ;;  %vm427_vm7 = vcmp.eq.s32.totalorder %v4749_v31, 1  ;;  %v4758_v7 = vld [vmem:[#allocation40_spill] sm:$0xff]  ;;  %v4762_v33 = vld [vmem:[#allocation53_spill] sm:$0xff] }
 0x1bb   :  { %vm577_vm0 = vcmp.eq.s32.totalorder %v4750_v5, 1  ;;  %vm726_vm12 = vcmp.eq.s32.totalorder %v4751_v36, 1  ;;  %v1063_v37 = vsel %vm444_vm2, %v1038_v8, -inf  ;;  %v1212_v35 = vsel %vm444_vm2, %v1187_v46, -inf  ;;  %v2637_v5 = vld [vmem:[%s4562_s5 + $0x30] ss:$8 sps:$4 sm:$0xff]  }
 0x1bc   :  { %v1361_v27 = vsel %vm444_vm2, %v1336_v60, -inf  ;;  %v1510_v51 = vsel %vm444_vm2, %v1485_v12, -inf  ;;  %v4238_v41 = vmax.f32 %v1063_v37, %v1069_v15  ;;  %v4240_v11 = vmax.f32 %v1212_v35, %v1217_v59  ;;  %v2639_v36 = vld [vmem:[%s4562_s5 + $0x34] ss:$8 sps:$4 sm:$0xff]  }
 0x1bd   :  { %v4242_v1 = vmax.f32 %v1361_v27, %v1366_v19  ;;  %v4244_v4 = vmax.f32 %v1510_v51, %v1513_v25  ;;  %v440_v48 = vsel %vm424_vm11, %v328_v30, -inf  ;;  %vm4753_vm14 = vcmp.eq.s32.totalorder %v4745_v6, 1  ;;  %v298_v19 = vpop.permute.xlu1 %297  ;;  %v4756_v25 = vld [vmem:[#allocation26_spill] sm:$0xff]  ;;  %1667 = vmatprep.subr.bf16.mxu0 %v2639_v36 }
 0x1be   :  { %v590_v49 = vsel %vm4753_vm14, %v328_v30, -inf  ;;  %vm4754_vm15 = vcmp.eq.s32.totalorder %v4746_v55, 1  ;;  %vm4755_vm10 = vcmp.eq.s32.totalorder %v4747_v44, 1  ;;  %vm1024_vm13 = vcmp.eq.s32.totalorder %v3699_v63, 1  ;;  %1668 = vmatpush1.bf16.msra.mxu0 %v2637_v5 }
 0x1bf   :  { %v739_v17 = vsel %vm4754_vm15, %v328_v30, -inf  ;;  %v888_v56 = vsel %vm4755_vm10, %v328_v30, -inf  ;;  %vm1173_vm8 = vcmp.eq.s32.totalorder %v3849_v62, 1  ;;  %vm1322_vm1 = vcmp.eq.s32.totalorder %v4037_v26, 1 }
 0x1c0   :  { %vm1471_vm4 = vcmp.eq.s32.totalorder %v4135_v29, 1  ;;  %v465_v57 = vsel %vm444_vm2, %v440_v48, -inf  ;;  %v614_v24 = vsel %vm444_vm2, %v590_v49, -inf  ;;  %v763_v13 = vsel %vm444_vm2, %v739_v17, -inf  ;;  %v2642_v48 = vld [vmem:[%s4562_s5 + $0x44] ss:$8 sps:$4 sm:$0xff]  }
 0x1c1   :  { %v912_v6 = vsel %vm444_vm2, %v888_v56, -inf  ;;  %v470_v55 = vmax.f32 %v465_v57, %v4214_v20  ;;  %v619_v44 = vmax.f32 %v614_v24, %v4216_v21  ;;  %v768_v53 = vmax.f32 %v763_v13, %v4218_v3  ;;  %v4763_v21 = vld [vmem:[#allocation54_spill] sm:$0xff]  ;;  %1669 = vmatprep.subr.bf16.mxu0 %v2642_v48 }
 0x1c2   :  { %v917_v15 = vmax.f32 %v912_v6, %v4220_v52  ;;  %v1037_v59 = vsel %vm1021_vm6, %v328_v30, -inf  ;;  %v1186_v45 = vsel %vm1170_vm3, %v328_v30, -inf  ;;  %v1335_v9 = vsel %vm1319_vm9, %v328_v30, -inf  ;;  %v2640_v29 = vld [vmem:[%s4562_s5 + $0x40] ss:$8 sps:$4 sm:$0xff]  }
 0x1c3   :  { %v1484_v43 = vsel %vm1468_vm5, %v328_v30, -inf  ;;  %vm426_vm11 = vcmp.eq.s32.totalorder %v4756_v25, 1  ;;  %vm576_vm14 = vcmp.eq.s32.totalorder %v4757_v28, 1  ;;  %vm725_vm15 = vcmp.eq.s32.totalorder %v4758_v7, 1  ;;  %1670 = vmatpush1.bf16.msra.mxu0 %v2640_v29 }
 0x1c4   :  { %v1061_v18 = vsel %vm444_vm2, %v1037_v59, -inf  ;;  %v1210_v14 = vsel %vm444_vm2, %v1186_v45, -inf  ;;  %v1359_v40 = vsel %vm444_vm2, %v1335_v9, -inf  ;;  %v1508_v23 = vsel %vm444_vm2, %v1484_v43, -inf }
 0x1c5   :  { %v1066_v61 = vmax.f32 %v1061_v18, %v4238_v41  ;;  %v1218_v30 = vmax.f32 %v1210_v14, %v4240_v11  ;;  %v1367_v47 = vmax.f32 %v1359_v40, %v4242_v1  ;;  %v1516_v2 = vmax.f32 %v1508_v23, %v4244_v4  ;;  %v2643_v14 = vld [vmem:[%s4562_s5 + $0x50] ss:$8 sps:$4 sm:$0xff]  }
 0x1c6   :  { %vm4760_vm5 = vcmask 261120   ;;  %v4295_v20 = vmul.f32 %v229_v10, %v4762_v33  ;;  %v4298_v3 = vmul.f32 %v229_v10, %v4763_v21  ;;  %vm1023_vm3 = vcmp.eq.s32.totalorder %v3701_v58, 1 }
 0x1c7   :  { %v331_v16 = vsel %vm4760_vm5, %v2699_v54, %v298_v19  ;;  %vm4761_vm9 = vmmov %vm4760_vm5  ;;  %vm1172_vm6 = vcmp.eq.s32.totalorder %v3851_v34, 1  ;;  %vm1321_vm10 = vcmp.eq.s32.totalorder %v4039_v22, 1  ;;  %vm1470_vm5 = vcmp.eq.s32.totalorder %v4137_v32, 1  ;;  %v2648_v34 = vld [vmem:[%s4562_s5 + $0x64] ss:$8 sps:$4 sm:$0xff]  }
 0x1c8   :  { %v330_v50 = vsel %vm4761_vm9, %v2700_v38, %v296_v39  ;;  %v443_v52 = vsel %vm427_vm7, %v331_v16, -inf  ;;  %v593_v8 = vsel %vm577_vm0, %v331_v16, -inf  ;;  %v742_v46 = vsel %vm726_vm12, %v331_v16, -inf }
 0x1c9   :  { %vm4764_vm9 = vcmp.eq.s32.totalorder %v4752_v0, 1  ;;  %v471_v12 = vsel %vm444_vm2, %v443_v52, -inf  ;;  %v620_v39 = vsel %vm444_vm2, %v593_v8, -inf  ;;  %v769_v37 = vsel %vm444_vm2, %v742_v46, -inf  ;;  %v2646_v8 = vld [vmem:[%s4562_s5 + $0x60] ss:$8 sps:$4 sm:$0xff]  }
 0x1ca   :  { %v891_v60 = vsel %vm4764_vm9, %v331_v16, -inf  ;;  %v474_v27 = vmax.f32 %v470_v55, %v471_v12  ;;  %v623_v31 = vmax.f32 %v619_v44, %v620_v39  ;;  %v772_v51 = vmax.f32 %v768_v53, %v769_v37  ;;  %v2645_v53 = vld [vmem:[%s4562_s5 + $0x54] ss:$8 sps:$4 sm:$0xff]  }
 0x1cb   :  { %v918_v35 = vsel %vm444_vm2, %v891_v60, -inf  ;;  %v1040_v0 = vsel %vm1024_vm13, %v331_v16, -inf  ;;  %v1189_v11 = vsel %vm1173_vm8, %v331_v16, -inf  ;;  %v1338_v1 = vsel %vm1322_vm1, %v331_v16, -inf  ;;  %1671 = vmatprep.subr.bf16.mxu0 %v2645_v53 }
 0x1cc   :  { %v921_v41 = vmax.f32 %v917_v15, %v918_v35  ;;  %v1487_v4 = vsel %vm1471_vm4, %v331_v16, -inf  ;;  %v1067_v49 = vsel %vm444_vm2, %v1040_v0, -inf  ;;  %v1216_v17 = vsel %vm444_vm2, %v1189_v11, -inf  ;;  %1672 = vmatpush1.bf16.msra.mxu0 %v2643_v14 }
 0x1cd   :  { %v1365_v63 = vsel %vm444_vm2, %v1338_v1, -inf  ;;  %v1514_v56 = vsel %vm444_vm2, %v1487_v4, -inf  ;;  %v1070_v62 = vmax.f32 %v1066_v61, %v1067_v49  ;;  %v1219_v57 = vmax.f32 %v1216_v17, %v1218_v30  ;;  %1673 = vmatprep.subr.bf16.mxu0 %v2648_v34 }
 0x1ce   :  { %v1368_v26 = vmax.f32 %v1365_v63, %v1367_v47  ;;  %v1517_v24 = vmax.f32 %v1514_v56, %v1516_v2  ;;  %v442_v13 = vsel %vm426_vm11, %v330_v50, -inf  ;;  %v592_v6 = vsel %vm576_vm14, %v330_v50, -inf }
 0x1cf   :  { %v741_v55 = vsel %vm725_vm15, %v330_v50, -inf  ;;  %vm4765_vm7 = vcmp.eq.s32.totalorder %v4759_v42, 1  ;;  %v469_v15 = vsel %vm444_vm2, %v442_v13, -inf  ;;  %v618_v59 = vsel %vm444_vm2, %v592_v6, -inf  ;;  %v2649_v6 = vld [vmem:[%s4562_s5 + $0x70] ss:$8 sps:$4 sm:$0xff]  }
 0x1d0   :  { %v890_v44 = vsel %vm4765_vm7, %v330_v50, -inf  ;;  %v767_v45 = vsel %vm444_vm2, %v741_v55, -inf  ;;  %v475_v43 = vmax.f32 %v469_v15, %v474_v27  ;;  %v624_v19 = vmax.f32 %v618_v59, %v623_v31  ;;  %1674 = vmatpush1.bf16.msra.mxu0 %v2646_v8  ;;  %v2651_v55 = vld [vmem:[%s4562_s5 + $0x74] ss:$8 sps:$4 sm:$0xff]   ;;  %v2660_v8 = vld [vmem:[%s4562_s5 + $0x140] ss:$8 sps:$4 sm:$0xff]  }
 0x1d1   :  { %v916_v9 = vsel %vm444_vm2, %v890_v44, -inf  ;;  %v773_v10 = vmax.f32 %v767_v45, %v772_v51  ;;  %v1039_v28 = vsel %vm1023_vm3, %v330_v50, -inf  ;;  %v1188_v7 = vsel %vm1172_vm6, %v330_v50, -inf  ;;  %1675 = vmatprep.subr.bf16.mxu0 %v2651_v55 }
 0x1d2   :  { %v922_v25 = vmax.f32 %v916_v9, %v921_v41  ;;  %v1337_v42 = vsel %vm1321_vm10, %v330_v50, -inf  ;;  %v1486_v18 = vsel %vm1470_vm5, %v330_v50, -inf  ;;  %v476_v40 = vrot.slane %v475_v43, 4 }
 0x1d3   :  { %v625_v23 = vrot.slane %v624_v19, 4  ;;  %v1065_v61 = vsel %vm444_vm2, %v1039_v28, -inf  ;;  %v1214_v58 = vsel %vm444_vm2, %v1188_v7, -inf  ;;  %v1363_v32 = vsel %vm444_vm2, %v1337_v42, -inf  ;;  %v2653_v28 = vld [vmem:[%s4562_s5 + $0x80] ss:$8 sps:$4 sm:$0xff]  }
 0x1d4   :  { %v1071_v22 = vmax.f32 %v1065_v61, %v1070_v62  ;;  %v1220_v30 = vmax.f32 %v1214_v58, %v1219_v57  ;;  %v1512_v47 = vsel %vm444_vm2, %v1486_v18, -inf  ;;  %v1369_v2 = vmax.f32 %v1363_v32, %v1368_v26  ;;  %1676 = vmatpush1.bf16.msra.mxu0 %v2649_v6  ;;  %v2654_v7 = vld [vmem:[%s4562_s5 + $0x110] ss:$8 sps:$4 sm:$0xff]  }
 0x1d5   :  { %v1518_v54 = vmax.f32 %v1512_v47, %v1517_v24  ;;  %v233_v16 = vmul.f32 %v4295_v20, %v4295_v20  ;;  %v477_v38 = vmax.f32 %v475_v43, %v476_v40  ;;  %vm1525_vm0 = vcmask 1040384   ;;  %v2652_v43 = vld [vmem:[%s4562_s5 + $0x100] ss:$8 sps:$4 sm:$0xff]   ;;  %v2655_v61 = vld [vmem:[%s4562_s5 + $0x90] ss:$8 sps:$4 sm:$0xff]  }
 0x1d6   :  { %v626_v50 = vmax.f32 %v624_v19, %v625_v23  ;;  %v774_v33 = vrot.slane %v773_v10, 4  ;;  %v923_v21 = vrot.slane %v922_v25, 4  ;;  %v1072_v52 = vrot.slane %v1071_v22, 4  ;;  %2394 = vmatprep.subr.bf16.mxu1 %v2652_v43 }
 0x1d7   :  { %v234_v46 = vsub.f32 %v4298_v3, %v233_v16  ;;  %v478_v60 = vrot.slane %v477_v38, 2  ;;  %v1221_v12 = vrot.slane %v1220_v30, 4  ;;  %v1370_v39 = vrot.slane %v1369_v2, 4  ;;  %2395 = vmatpush3.bf16.msra.mxu1 %v2653_v28  ;;  %v2657_v16 = vld [vmem:[%s4562_s5 + $0xa0] ss:$8 sps:$4 sm:$0xff]  }
 0x1d8   :  { %v627_v37 = vrot.slane %v626_v50, 2  ;;  %v775_v35 = vmax.f32 %v773_v10, %v774_v33  ;;  %v924_v27 = vmax.f32 %v922_v25, %v923_v21  ;;  %v1073_v31 = vmax.f32 %v1071_v22, %v1072_v52  ;;  %2396 = vmatprep.subr.bf16.mxu1 %v2654_v7  ;;  %v2656_v22 = vld [vmem:[%s4562_s5 + $0x120] ss:$8 sps:$4 sm:$0xff]   ;;  %v2659_v52 = vld [vmem:[%s4562_s5 + $0xb0] ss:$8 sps:$4 sm:$0xff]  }
 0x1d9   :  { %1545 = vrot.lane.b32.xlu0 %v234_v46, %s2707_s30  ;;  %v479_v51 = vmax.f32 %v477_v38, %v478_v60  ;;  %v1222_v41 = vmax.f32 %v1220_v30, %v1221_v12  ;;  %v1371_v5 = vmax.f32 %v1369_v2, %v1370_v39  ;;  %v1519_v36 = vrot.slane %v1518_v54, 4  ;;  %v2661_v46 = vld [vmem:[%s4562_s5 + $0xc0] ss:$8 sps:$4 sm:$0xff]   ;;  %v2663_v60 = vld [vmem:[%s4562_s5 + $0xd0] ss:$8 sps:$4 sm:$0xff]  }
 0x1da   :  { %v628_v0 = vmax.f32 %v626_v50, %v627_v37  ;;  %v776_v11 = vrot.slane %v775_v35, 2  ;;  %v925_v1 = vrot.slane %v924_v27, 2  ;;  %v1074_v4 = vrot.slane %v1073_v31, 2  ;;  %v2658_v50 = vld [vmem:[%s4562_s5 + $0x130] ss:$8 sps:$4 sm:$0xff]  }
 0x1db   :  { %v480_v3 = vrot.slane %v479_v51, 1  ;;  %v1223_v48 = vrot.slane %v1222_v41, 2  ;;  %v1372_v49 = vrot.slane %v1371_v5, 2  ;;  %v1520_v17 = vmax.f32 %v1518_v54, %v1519_v36  ;;  %2397 = vmatpush3.bf16.msra.mxu1 %v2655_v61  ;;  %v2668_v36 = vld [vmem:[%s4562_s5 + $0x180] ss:$8 sps:$4 sm:$0xff]  }
 0x1dc   :  { %v629_v63 = vrot.slane %v628_v0, 1  ;;  %v777_v56 = vmax.f32 %v775_v35, %v776_v11  ;;  %v926_v62 = vmax.f32 %v924_v27, %v925_v1  ;;  %v1075_v57 = vmax.f32 %v1073_v31, %v1074_v4  ;;  %2398 = vmatprep.subr.bf16.mxu1 %v2656_v22  ;;  %v2664_v31 = vld [vmem:[%s4562_s5 + $0x160] ss:$8 sps:$4 sm:$0xff]   ;;  %v2671_v1 = vld [vmem:[%s4562_s5 + $0x1b0] ss:$8 sps:$4 sm:$0xff]  }
 0x1dd   :  { %v481_v26 = vmax.f32 %v479_v51, %v480_v3  ;;  %v1224_v24 = vmax.f32 %v1222_v41, %v1223_v48  ;;  %v1373_v29 = vmax.f32 %v1371_v5, %v1372_v49  ;;  %v1521_v13 = vrot.slane %v1520_v17, 2  ;;  %v2665_v51 = vld [vmem:[%s4562_s5 + $0xe0] ss:$8 sps:$4 sm:$0xff]   ;;  %v2666_v41 = vld [vmem:[%s4562_s5 + $0x170] ss:$8 sps:$4 sm:$0xff]  }
 0x1de   :  { %v630_v44 = vmax.f32 %v628_v0, %v629_v63  ;;  %v778_v53 = vrot.slane %v777_v56, 1  ;;  %v927_v15 = vrot.slane %v926_v62, 1  ;;  %v1076_v59 = vrot.slane %v1075_v57, 1  ;;  %v2667_v5 = vld [vmem:[%s4562_s5 + $0xf0] ss:$8 sps:$4 sm:$0xff]   ;;  %v4769_v48 = vld [vmem:[#allocation2_spill] sm:$0xff] }
 0x1df   :  { %v1225_v45 = vrot.slane %v1224_v24, 1  ;;  %v1522_v9 = vmax.f32 %v1520_v17, %v1521_v13  ;;  %vm1527_vm12 = vcmask 1041408   ;;  %v1374_v10 = vrot.slane %v1373_v29, 1  ;;  %2399 = vmatpush3.bf16.msra.mxu1 %v2657_v16  ;;  %v2669_v0 = vld [vmem:[%s4562_s5 + $0x190] ss:$8 sps:$4 sm:$0xff]  }
 0x1e0   :  { %v779_v19 = vmax.f32 %v777_v56, %v778_v53  ;;  %v1526_v25 = vsel %vm1525_vm0, %v481_v26, %v630_v44  ;;  %vm1529_vm4 = vcmask 1042432   ;;  %v928_v42 = vmax.f32 %v926_v62, %v927_v15  ;;  %2400 = vmatprep.subr.bf16.mxu1 %v2658_v50  ;;  %v2670_v11 = vld [vmem:[%s4562_s5 + $0x1a0] ss:$8 sps:$4 sm:$0xff]   ;;  %v2673_v3 = vld [vmem:[%s4562_s5 + $0x1d0] ss:$8 sps:$4 sm:$0xff]  }
 0x1e1   :  { %v1523_v18 = vrot.slane %v1522_v9, 1  ;;  %vm1531_vm13 = vcmask 1043456   ;;  %v4766_v14 = vmov 0.0   ;;  %v1077_v40 = vmax.f32 %v1075_v57, %v1076_v59  ;;  %v2672_v4 = vld [vmem:[%s4562_s5 + $0x1c0] ss:$8 sps:$4 sm:$0xff]  }
 0x1e2   :  { %2510 = vmatprep.subr.bf16.mxu0 %v4766_v14  ;;  %v1528_v23 = vsel %vm1527_vm12, %v1526_v25, %v779_v19  ;;  %vm1533_vm8 = vcmask 1044480   ;;  %v1226_v58 = vmax.f32 %v1224_v24, %v1225_v45  ;;  %vm1535_vm1 = vcmask 1045504   ;;  %v1569_v17 = vld [vmem:[%s4563_s6] ss:$8 sm:$0x3] }
 0x1e3   :  { %v1530_v34 = vsel %vm1529_vm4, %v1528_v23, %v928_v42  ;;  %v1375_v30 = vmax.f32 %v1373_v29, %v1374_v10  ;;  %vm1537_vm11 = vcmask 1046528   ;;  %v1524_v47 = vmax.f32 %v1522_v9, %v1523_v18  ;;  %2401 = vmatpush3.bf16.msra.mxu1 %v2659_v52  ;;  %v2674_v59 = vld [vmem:[%s4562_s5 + $0x1e0] ss:$8 sps:$4 sm:$0xff]   ;;  %v2675_v45 = vld [vmem:[%s4562_s5 + $0x1f0] ss:$8 sps:$4 sm:$0xff]  }
 0x1e4   :  { %v1532_v32 = vsel %vm1531_vm13, %v1530_v34, %v1077_v40  ;;  %vm4767_vm14 = vcmask 261120   ;;  %2402 = vmatprep.subr.bf16.mxu1 %v2660_v8  ;;  %vm1550_vm15 = vcmask 785408   ;;  %vm4768_vm10 = vmmov 0   ;;  %v1993_v9 = vld [vmem:[%s4562_s5 + $0x240] sm:$0xf] }
 0x1e5   :  { %v1534_v2 = vsel %vm1533_vm8, %v1532_v32, %v1226_v58  ;;  %v1573_v49 = vsub.s32 0, %v4769_v48  ;;  %v1577_v63 = vsub.s32 1, %v4769_v48  ;;  %v2000_v43 = vsel %vm1531_vm13, %v1993_v9, 0  ;;  %v1992_v19 = vld [vmem:[%s4564_s3] sm:$0xff]  ;;  %v2677_v28 = vld [vmem:[%s4562_s5 + $0x210] ss:$8 sps:$4 sm:$0xff]  }
 0x1e6   :  { %v1536_v54 = vsel %vm1535_vm1, %v1534_v2, %v1375_v30  ;;  %v1994_v10 = vpack.c.bf16 %v1992_v19, %v1992_v19  ;;  %vm1995_vm3 = vcmask 64512   ;;  %v2676_v25 = vld [vmem:[%s4562_s5 + $0x200] ss:$8 sps:$4 sm:$0xff]   ;;  %v2679_v32 = vld [vmem:[%s4562_s5 + $0x230] ss:$8 sps:$4 sm:$0xff]   ;;  %vm2246_vm5 = vcmask 130048  }
 0x1e7   :  { %v1538_v38 = vsel %vm1537_vm11, %v1536_v54, %v1524_v47  ;;  %2403 = vmatpush3.bf16.msra.mxu1 %v2661_v46  ;;  %v1574_v56 = vrot.slane %v1569_v17, %v1573_v49  ;;  %v1578_v62 = vrot.slane %v1569_v17, %v1577_v63  ;;  %v1738_v42 = vld [vmem:[%s4563_s6 + $0x1] ss:$0 sm:$0xff]  ;;  %vm2295_vm9 = vcmask 269312  }
 0x1e8   :  { %1541 = vrot.lane.b32.xlu1 %v1538_v38, %s2708_s23  ;;  %v1539_v33 = vsub.f32 0.0, %v1538_v38  ;;  %v2678_v30 = vld [vmem:[%s4562_s5 + $0x220] ss:$8 sps:$4 sm:$0xff]  }
 0x1e9   :  { %v1893_v38 = vld [vmem:[%s4563_s6 + $0x2] ss:$0 sm:$0xff] }
 0x1ea   :  { %v1548_v21 = vsel %vm4767_vm14, %v4295_v20, %v1539_v33  ;;  %v2662_v20 = vld [vmem:[%s4562_s5 + $0x150] ss:$8 sps:$4 sm:$0xff]  }
 0x1eb   :  { %2404 = vmatprep.subr.bf16.mxu1 %v2662_v20 }
 0x1ec   :  { %2405 = vmatpush3.bf16.msra.mxu1 %v2663_v60  ;;  %v2680_v60 = vld [vmem:[%s4562_s5 + $0x250] ss:$8 sps:$4 sm:$0xff]  }
 0x1ed   :  { %2406 = vmatprep.subr.bf16.mxu1 %v2664_v31 }
 0x1f0   :  { %2407 = vmatpush3.bf16.msra.mxu1 %v2665_v51 }
 0x1f1   :  { %2408 = vmatprep.subr.bf16.mxu1 %v2666_v41 }
 0x1f4   :  { %2409 = vmatpush3.bf16.msra.mxu1 %v2667_v5 }
 0x1f5   :  { %2530 = vmatprep.subr.bf16.mxu1 %v4766_v14 }
 0x24b   :  { %v1546_v39 = vpop.permute.xlu0 %1545 }
 0x25a   :  { %v1542_v12 = vpop.permute.xlu1 %1541 }
 0x25b   :  { %v1549_v37 = vsel %vm444_vm2, %v1548_v21, %v1542_v12  ;;  %v2681_v12 = vld [vmem:[%s4562_s5 + $0x260] ss:$8 sps:$4 sm:$0xff]  }
 0x25c   :  { %v1551_v35 = vsel %vm1550_vm15, %v1549_v37, %v1546_v39  ;;  %v2682_v39 = vld [vmem:[%s4562_s5 + $0x270] ss:$8 sps:$4 sm:$0xff]  }
 0x25d   :  { %v1568_v27 = vpack.c.bf16 %v1551_v35, %v1551_v35  ;;  %v2109_v35 = vld [vmem:[%s4563_s6 + $0x3] ss:$0 sm:$0xff] }
 0x25f   :  { %1694 = vmatmul.mubr.bf16.vlgmr.msra.gmra.mrb[4].mxu0 %v1568_v27 }
 0x260   :  { %2526 = vmatprep.mubr.msk.bf16.mxu0 %vm4768_vm10, %v4766_v14  ;;  %2511 = vmatpush3.bf16.msra.mxu0 %v2668_v36 }
 0x261   :  { %2512 = vmatprep.subr.bf16.mxu0 %v4766_v14 }
 0x264   :  { %2513 = vmatpush3.bf16.msra.mxu0 %v2669_v0 }
 0x265   :  { %2514 = vmatprep.subr.bf16.mxu0 %v4766_v14 }
 0x268   :  { %2515 = vmatpush3.bf16.msra.mxu0 %v2670_v11  ;;  %v2683_v11 = vld [vmem:[%s4562_s5 + $0x280] ss:$8 sps:$4 sm:$0xff]  }
 0x269   :  { %2516 = vmatprep.subr.bf16.mxu0 %v4766_v14 }
 0x26c   :  { %2517 = vmatpush3.bf16.msra.mxu0 %v2671_v1  ;;  %v2684_v1 = vld [vmem:[%s4562_s5 + $0x290] ss:$8 sps:$4 sm:$0xff]  }
 0x26d   :  { %2518 = vmatprep.subr.bf16.mxu0 %v4766_v14 }
 0x270   :  { %2519 = vmatpush3.bf16.msra.mxu0 %v2672_v4  ;;  %v2117_v4 = vld [vmem:[%s4563_s6 + $0x4] ss:$0 sm:$0xff] }
 0x271   :  { %2520 = vmatprep.subr.bf16.mxu0 %v4766_v14 }
 0x274   :  { %2521 = vmatpush3.bf16.msra.mxu0 %v2673_v3 }
 0x275   :  { %2522 = vmatprep.subr.bf16.mxu0 %v4766_v14 }
 0x278   :  { %2523 = vmatpush3.bf16.msra.mxu0 %v2674_v59 }
 0x279   :  { %2524 = vmatprep.subr.bf16.mxu0 %v4766_v14 }
 0x27c   :  { %2525 = vmatpush3.bf16.msra.mxu0 %v2675_v45 }
 0x27d   :  { %2556 = vmatprep.subr.bf16.mxu0 %v4766_v14 }
 0x332   :  { %v1695_v57 = vpop.f32.mrb[4].mxu0 }
 0x333   :  { %v1696_v26 = vadd.f32 %v1695_v57, %v1574_v56  ;;  %v1697_v24 = vpop.f32.mrb[5].mxu0 }
 0x334   :  { %v1698_v29 = vadd.f32 %v1697_v24, %v1578_v62  ;;  %v1699_v13 = vpop.f32.mrb[6].mxu0  ;;  %v2179_v62 = vld [vmem:[%s4563_s6 + $0x5] ss:$0 sm:$0xff] }
 0x335   :  { %v1702_v6 = vmax.f32 %v1696_v26, 0.0  ;;  %v1700_v55 = vpop.f32.mrb[7].mxu0 }
 0x336   :  { %v1703_v44 = vmax.f32 %v1698_v29, 0.0 }
 0x337   :  { %v1736_v15 = vpack.c.bf16 %v1702_v6, %v1702_v6 }
 0x338   :  { %v1737_v53 = vpack.c.bf16 %v1703_v44, %v1703_v44  ;;  %v2239_v44 = vld [vmem:[%s4563_s6 + $0x6] ss:$0 sm:$0xff] }
 0x33a   :  { %1867 = vmatprep.mubr.bf16.mxu1 %v1737_v53 }
 0x33b   :  { %1868 = vmatmul.mubr.bf16.vlgmr.msra.gmra.mrb[4].mxu1 %v1736_v15 }
 0x33c   :  { %2532 = vmatprep.mubr.msk.bf16.mxu1 %vm4768_vm10, %v4766_v14  ;;  %2531 = vmatpush3.bf16.msra.mxu1 %v2000_v43 }
 0x33d   :  { %2536 = vmatprep.subr.bf16.mxu1 %v4766_v14 }
 0x343   :  { %2533 = vmatmul.mubr.msk.bf16.vlgmr.msra.gmra.mrb[8].mxu1 %vm1995_vm3, %v1994_v10 }
 0x344   :  { %2537 = vmatpush3.bf16.msra.mxu1 %v2676_v25  ;;  %2544 = vmatprep.mubr.msk.bf16.mxu1 %vm4768_vm10, %v4766_v14 }
 0x345   :  { %2538 = vmatprep.subr.bf16.mxu1 %v4766_v14 }
 0x348   :  { %2539 = vmatpush3.bf16.msra.mxu1 %v2677_v28 }
 0x349   :  { %2540 = vmatprep.subr.bf16.mxu1 %v4766_v14 }
 0x34c   :  { %2541 = vmatpush3.bf16.msra.mxu1 %v2678_v30 }
 0x34d   :  { %2542 = vmatprep.subr.bf16.mxu1 %v4766_v14 }
 0x350   :  { %2543 = vmatpush3.bf16.msra.mxu1 %v2679_v32 }
 0x351   :  { %2548 = vmatprep.subr.bf16.mxu1 %v4766_v14 }
 0x40e   :  { %v2410_v7 = vpop.f32.mrb[4].mxu1 }
 0x40f   :  { %v2411_v18 = vpop.f32.mrb[5].mxu1 }
 0x410   :  { %v2412_v40 = vadd.f32 %v2411_v18, %v2410_v7  ;;  %v2413_v23 = vpop.f32.mrb[6].mxu1 }
 0x411   :  { %v2414_v61 = vpop.f32.mrb[7].mxu1 }
 0x412   :  { %v1870_v58 = vadd.f32 %v2412_v40, %v1738_v42 }
 0x414   :  { %v1875_v34 = vmax.f32 %v1870_v58, 0.0 }
 0x416   :  { %v1892_v22 = vpack.c.bf16 %v1875_v34, %v1875_v34  ;;  %v2036_v47 = vpop.f32.mrb[8].mxu1 }
 0x417   :  { %v2534_v2 = vpop.f32.mrb[9].mxu1 }
 0x418   :  { %2527 = vmatmul.mubr.bf16.vlgmr.msra.gmra.mrb[8].mxu0 %v1892_v22  ;;  %v2039_v54 = vpop.f32.mrb[10].mxu1 }
 0x419   :  { %2560 = vmatprep.mubr.msk.bf16.mxu0 %vm4768_vm10, %v4766_v14  ;;  %v2535_v16 = vpop.f32.mrb[11].mxu1  ;;  %2557 = vmatpush3.bf16.msra.mxu0 %v2682_v39 }
 0x41a   :  { %2558 = vmatprep.subr.bf16.mxu0 %v4766_v14 }
 0x41d   :  { %2559 = vmatpush3.bf16.msra.mxu0 %v2683_v11 }
 0x4eb   :  { %v1976_v50 = vpop.f32.mrb[8].mxu0 }
 0x4ec   :  { %v1977_v33 = vadd.f32 %v1976_v50, %v1893_v38  ;;  %v2528_v21 = vpop.f32.mrb[9].mxu0 }
 0x4ed   :  { %v1979_v52 = vpop.f32.mrb[10].mxu0 }
 0x4ee   :  { %v1982_v8 = vmax.f32 %v1977_v33, 0.0  ;;  %v2529_v46 = vpop.f32.mrb[11].mxu0 }
 0x4f0   :  { %v1991_v20 = vpack.c.bf16 %v1982_v8, %v1982_v8 }
 0x4f2   :  { %2545 = vmatmul.mubr.msk.bf16.vlgmr.msra.gmra.mrb[12].mxu1 %vm444_vm2, %v1991_v20  ;;  %vm4770_vm2 = vmmov %vm4767_vm14 }
 0x4f3   :  { %2552 = vmatprep.mubr.msk.bf16.mxu1 %vm4768_vm10, %v4766_v14  ;;  %2549 = vmatpush3.bf16.msra.mxu1 %v2680_v60  ;;  %vm4771_vm6 = vmmov %vm4770_vm2 }
 0x4f4   :  { %2550 = vmatprep.subr.bf16.mxu1 %v4766_v14  ;;  %vm4772_vm7 = vmmov %vm4770_vm2 }
 0x4f7   :  { %2551 = vmatpush3.bf16.msra.mxu1 %v2681_v12 }
 0x4f8   :  { %2564 = vmatprep.subr.bf16.mxu1 %v4766_v14 }
 0x5c5   :  { %v2103_v37 = vpop.f32.mrb[12].mxu1 }
 0x5c6   :  { %v2104_v27 = vadd.f32 %v2103_v37, %v2036_v47  ;;  %v2546_v31 = vpop.f32.mrb[13].mxu1 }
 0x5c7   :  { %v2106_v51 = vpop.f32.mrb[14].mxu1 }
 0x5c8   :  { %v2110_v41 = vadd.f32 %v2109_v35, %v2104_v27  ;;  %v2547_v5 = vpop.f32.mrb[15].mxu1 }
 0x5ca   :  { %v2111_v36 = vmax.f32 %v2110_v41, 0.0 }
 0x5cc   :  { %v2116_v0 = vpack.c.bf16 %v2111_v36, %v2111_v36 }
 0x5ce   :  { %2553 = vmatmul.mubr.msk.bf16.vlgmr.msra.gmra.mrb[16].mxu1 %vm4770_vm2, %v2116_v0 }
 0x5cf   :  { %2566 = vmatprep.mubr.msk.bf16.mxu1 %vm4768_vm10, %v4766_v14  ;;  %2565 = vmatpush3.bf16.msra.mxu1 %v2684_v1 }
 0x6a1   :  { %v2167_v3 = vpop.f32.mrb[16].mxu1 }
 0x6a2   :  { %v2168_v48 = vadd.f32 %v2167_v3, %v2117_v4  ;;  %v2554_v49 = vpop.f32.mrb[17].mxu1 }
 0x6a3   :  { %v2170_v17 = vpop.f32.mrb[18].mxu1 }
 0x6a4   :  { %v2173_v63 = vmax.f32 %v2168_v48, 0.0  ;;  %v2555_v14 = vpop.f32.mrb[19].mxu1 }
 0x6a6   :  { %v2178_v56 = vpack.c.bf16 %v2173_v63, %v2173_v63 }
 0x6a8   :  { %2561 = vmatmul.mubr.msk.bf16.vlgmr.msra.gmra.mrb[12].mxu0 %vm4771_vm6, %v2178_v56 }
 0x77b   :  { %v2229_v57 = vpop.f32.mrb[12].mxu0 }
 0x77c   :  { %v2230_v26 = vadd.f32 %v2229_v57, %v2179_v62  ;;  %v2562_v24 = vpop.f32.mrb[13].mxu0 }
 0x77d   :  { %v2232_v29 = vpop.f32.mrb[14].mxu0 }
 0x77e   :  { %v2235_v13 = vmax.f32 %v2230_v26, 0.0  ;;  %v2563_v6 = vpop.f32.mrb[15].mxu0 }
 0x780   :  { %v2238_v55 = vpack.c.bf16 %v2235_v13, %v2235_v13 }
 0x782   :  { %2567 = vmatmul.mubr.msk.bf16.vlgmr.msra.gmra.mrb[20].mxu1 %vm2246_vm5, %v2238_v55 }
 0x855   :  { %v2284_v53 = vpop.f32.mrb[20].mxu1 }
 0x856   :  { %v2285_v15 = vadd.f32 %v2284_v53, %v2239_v44  ;;  %v2568_v59 = vpop.f32.mrb[21].mxu1 }
 0x857   :  { %v2287_v45 = vpop.f32.mrb[22].mxu1 }
 0x858   :  { %2291 = vrot.lane.b32.xlu1 %v2285_v15, %s2706_s2  ;;  %v2569_v9 = vpop.f32.mrb[23].mxu1 }
 0x8ca   :  { %v2292_v43 = vpop.permute.xlu1 %2291 }
 0x8cb   :  { %v2294_v19 = vsel %vm4772_vm7, %v2110_v41, %v2292_v43 }
 0x8cc   :  { %v2296_v10 = vsel %vm2295_vm9, %v2294_v19, 0.0 }
 0x8cd   :  { %2297 = vst [vmem:[%s4565_s7] sm:$0xff] %v2296_v10 }

</bundles_post_ra>
